<compile_context>
chip_gen: v5e
topology: v5e:2x2
jax: 0.10.0
libtpu: 0.0.40
codegen_flags: <defaults>
</compile_context>

<pallas_src>
import jax
import jax.numpy as jnp
import numpy as np
from jax.experimental import pallas as pl
from jax.experimental.pallas import tpu as pltpu

LN_EPS = 1e-5   # torch.nn.LayerNorm default eps
EPS = 1e-5      # the explicit 1e-05 used in the module


def _elu(y):
    return jnp.where(y > 0, y, jnp.exp(y) - 1.0)


def _layernorm(y, gamma, beta):
    mu = jnp.mean(y, axis=-1, keepdims=True)
    var = jnp.mean((y - mu) ** 2, axis=-1, keepdims=True)
    return (y - mu) * jax.lax.rsqrt(var + LN_EPS) * gamma + beta


def _pick_batch_tile(B, L, D, vmem_budget_bytes=24 << 20):
    """Largest divisor of B whose resident working set stays under budget.

    ~12 live (TB*L, D) f32 temporaries (inputs, v, attn_exp_full, num/den
    accumulators, rolled copies, output) per batch element, double-buffered
    I/O included in the margin. Budget is kept < 32 MiB scoped default so the
    same choice is safe on v7x (64 MiB physical VMEM per TC).
    """
    per_batch = 12 * L * D * 4
    cap = max(1, min(B, vmem_budget_bytes // max(per_batch, 1)))
    for c in range(cap, 0, -1):
        if B % c == 0:
            return c
    return 1


def sliding_attn_forward(x, mask, params, *, num_heads, window_size, dilation,
                         batch_tile=None):
    B, L, D = x.shape
    H, W = num_heads, window_size
    Dh = D // H
    f32 = jnp.float32
    DOT = dict(preferred_element_type=f32, precision=jax.lax.Precision.HIGHEST)

    TB = batch_tile if batch_tile is not None else _pick_batch_tile(B, L, D)
    assert B % TB == 0, "batch tile must divide batch"
    R = TB * L

    not_mask = (~mask).astype(f32)[..., None]                # (B, L, 1)

    # Host-precomputed 0/1 expansion matrices (per-head scalar -> per-feature).
    E_np = np.kron(np.eye(H, dtype=np.float32),
                   np.ones((1, Dh), np.float32))              # (H, D)
    E_all_np = np.kron(np.eye(W + 1, dtype=np.float32), E_np)  # ((W+1)H,(W+1)D)
    E = jnp.asarray(E_np)
    E_all = jnp.asarray(E_all_np)

    def kernel(x_ref, nm_ref, e_ref, eall_ref,
               wa_ref, ba_ref,
               wv_ref, bv_ref, gv_ref, bev_ref,
               wp1_ref, bp1_ref, gp1_ref, bep1_ref, wp2_ref, bp2_ref,
               wo_ref, bo_ref, go_ref, beo_ref,
               out_ref):
        x2 = x_ref[...].reshape(R, D)                         # (TB*L, D)
        nm2 = nm_ref[...].reshape(R, 1)                       # (TB*L, 1)

        # ---- attn_exp (masked) and v = ELU(LN(Linear(x))) ----
        logits = jnp.dot(x2, wa_ref[...], **DOT) + ba_ref[...]      # (R, H)
        attn_exp = jnp.exp(logits) * nm2                             # (R, H)
        v2 = jnp.dot(x2, wv_ref[...], **DOT) + bv_ref[...]           # (R, D)
        v2 = _elu(_layernorm(v2, gv_ref[...], bev_ref[...]))

        # Per-head scalars broadcast to per-feature: ONE exact 0/1 matmul.
        aef2 = jnp.dot(attn_exp, e_ref[...], **DOT)                  # (R, D)
        aef3 = aef2.reshape(TB, L, D)
        v3 = v2.reshape(TB, L, D)

        # ---- global pooling (per-batch normalization over L) ----
        sum_full = jnp.sum(aef3, axis=1)                             # (TB, D)
        inv_sum = 1.0 / (sum_full + EPS)                             # (TB, D)
        g_pool = jnp.sum(aef3 * v3, axis=1) * inv_sum                # (TB, D)

        # ---- pos_net(g_pool); expand all W+1 window slots in one matmul ----
        p = jnp.dot(g_pool, wp1_ref[...], **DOT) + bp1_ref[...]      # (TB, H)
        p = _elu(_layernorm(p, gp1_ref[...], bep1_ref[...]))
        p = jnp.dot(p, wp2_ref[...], **DOT) + bp2_ref[...]           # (TB,(W+1)H)
        pos = jnp.exp(p)
        pos_full = jnp.dot(pos, eall_ref[...], **DOT)                # (TB,(W+1)D)

        pos0 = pos_full[:, 0:D][:, None, :]                          # (TB, 1, D)
        gp3 = g_pool[:, None, :]                                     # (TB, 1, D)

        # ---- sliding-window attention: XLU roll + boundary mask ----
        # Rolling the flattened (TB*L, D) slab is safe: rows that would bleed
        # across batch elements are exactly the out-of-range rows we mask.
        ridx = jax.lax.broadcasted_iota(jnp.int32, (L, 1), 0)        # (L, 1)
        den = None
        num = None
        for w in range(W):
            s = dilation * (w - W // 2)
            pos_w = pos_full[:, (w + 1) * D:(w + 2) * D][:, None, :]  # (TB,1,D)
            if s == 0:
                ae_s = aef3
                v_s = v3
            else:
                shift = (-s) % R
                valid = ((ridx + s >= 0) & (ridx + s < L)).astype(f32)  # (L,1)
                ae_s = pltpu.roll(aef2, shift, 0).reshape(TB, L, D) * valid[None]
                # v needs no mask: invalid rows already carry zero weight.
                v_s = pltpu.roll(v2, shift, 0).reshape(TB, L, D)
            wgt = ae_s * pos_w                                       # (TB, L, D)
            den = wgt if den is None else den + wgt
            num = wgt * v_s if num is None else num + wgt * v_s

        out_pre = (num + pos0 * gp3) / (den + pos0 + EPS)            # (TB, L, D)

        # ---- out_lin = ELU(LN(Linear(.))); Dropout(0.5) as identity ----
        # TODO(synk): training-mode Dropout(0.5) is stochastic; implemented as
        # identity (eval-mode semantics).
        y = jnp.dot(out_pre.reshape(R, D), wo_ref[...], **DOT) + bo_ref[...]
        y = _elu(_layernorm(y, go_ref[...], beo_ref[...]))
        out_ref[...] = y.reshape(TB, L, D)

    param_order = ["wa", "ba", "wv", "bv", "gv", "bev",
                   "wp1", "bp1", "gp1", "bep1", "wp2", "bp2",
                   "wo", "bo", "go", "beo"]
    param_vals = [params[k] for k in param_order]

    def full_spec(shape):
        nd = len(shape)
        return pl.BlockSpec(shape, lambda b, _nd=nd: (0,) * _nd)

    in_specs = [pl.BlockSpec((TB, L, D), lambda b: (b, 0, 0)),
                pl.BlockSpec((TB, L, 1), lambda b: (b, 0, 0)),
                full_spec(E.shape),
                full_spec(E_all.shape)]
    in_specs += [full_spec(p.shape) for p in param_vals]

    return pl.pallas_call(
        kernel,
        out_shape=jax.ShapeDtypeStruct((B, L, D), f32),
        grid=(B // TB,),
        in_specs=in_specs,
        out_specs=pl.BlockSpec((TB, L, D), lambda b: (b, 0, 0)),
        compiler_params=pltpu.CompilerParams(
            # Batch tiles are independent -> parallel (v7x: both TensorCores).
            dimension_semantics=("parallel",)),
    )(x, not_mask, E, E_all, *param_vals)


def sliding_attn_reference(x, mask, params, *, num_heads, window_size, dilation):
    """Pure-JAX mirror of the PyTorch forward (gather-based windows)."""
    B, L, D = x.shape
    H, W = num_heads, window_size
    Dh = D // H
    hp = jax.lax.Precision.HIGHEST
    nm = (~mask).astype(x.dtype)[..., None]

    attn_exp = jnp.exp(jnp.dot(x, params["wa"], precision=hp) + params["ba"]) * nm
    attn = attn_exp / (jnp.sum(attn_exp, axis=1, keepdims=True) + EPS)
    v = _elu(_layernorm(jnp.dot(x, params["wv"], precision=hp) + params["bv"],
                        params["gv"], params["bev"]))
    g_pool = jnp.sum(attn[..., None] * v.reshape(B, L, H, Dh), axis=1)   # (B, H, Dh)
    g_flat = g_pool.reshape(B, D)
    p = _elu(_layernorm(jnp.dot(g_flat, params["wp1"], precision=hp) + params["bp1"],
                        params["gp1"], params["bep1"]))
    p = jnp.dot(p, params["wp2"], precision=hp) + params["bp2"]
    pos = jnp.exp(p).reshape(B, 1, W + 1, H)

    idx = dilation * (jnp.arange(W)[None, :] - W // 2) + jnp.arange(L)[:, None]  # (L, W)
    idx = jnp.where(idx < 0, L, idx)
    idx = jnp.minimum(idx, L)

    def extract(a):
        a_pad = jnp.concatenate([a, jnp.zeros((B, 1, a.shape[2]), a.dtype)], axis=1)
        return a_pad[:, idx]                                   # (B, L, W, C)

    attn_win = extract(attn_exp)
    attn_win = jnp.concatenate([jnp.ones((B, L, 1, H), x.dtype), attn_win], axis=2)
    attn_win = attn_win * pos
    attn_win = attn_win / (jnp.sum(attn_win, axis=2, keepdims=True) + EPS)
    v_win = extract(v).reshape(B, L, W, H, Dh)
    out = jnp.sum(attn_win[:, :, 1:][..., None] * v_win, axis=2)
    out = out + attn_win[:, :, 0][..., None] * g_pool.reshape(B, 1, H, Dh)
    out = out.reshape(B, L, D)
    out = _elu(_layernorm(jnp.dot(out, params["wo"], precision=hp) + params["bo"],
                          params["go"], params["beo"]))
    return out


def init_params(key, dim, num_heads, window_size):
    H, W = num_heads, window_size
    ks = jax.random.split(key, 16)

    def lin_w(k, fi, fo, scale=0.2):
        return (scale * jax.random.normal(k, (fi, fo))).astype(jnp.float32)

    def vec(k, n, scale=0.1):
        return (scale * jax.random.normal(k, (1, n))).astype(jnp.float32)

    return {
        "wa": lin_w(ks[0], dim, H), "ba": vec(ks[1], H),
        "wv": lin_w(ks[2], dim, dim), "bv": vec(ks[3], dim),
        "gv": 1.0 + vec(ks[4], dim), "bev": vec(ks[5], dim),
        "wp1": lin_w(ks[6], dim, H), "bp1": vec(ks[7], H),
        "gp1": 1.0 + vec(ks[8], H), "bep1": vec(ks[9], H),
        "wp2": lin_w(ks[10], H, (W + 1) * H), "bp2": vec(ks[11], (W + 1) * H),
        "wo": lin_w(ks[12], dim, dim), "bo": vec(ks[13], dim),
        "go": 1.0 + vec(ks[14], dim), "beo": vec(ks[15], dim),
    }


if __name__ == "__main__":
    B, L, D = 2, 16, 32
    num_heads, window_size, dilation = 4, 5, 1
    # FeatureGenerator().aug_max_len only sizes the PyTorch index buffer; here
    # the window indices are generated analytically (requires L <= aug_max_len).

    key = jax.random.PRNGKey(0)
    kx, kp = jax.random.split(key)
    x = jax.random.normal(kx, (B, L, D), jnp.float32)
    lengths = jnp.array([14, 10], jnp.int32)
    mask = jnp.arange(L)[None, :] >= lengths[:, None]          # (B, L) bool

    params = init_params(kp, D, num_heads, window_size)

    out = sliding_attn_forward(x, mask, params, num_heads=num_heads,
                               window_size=window_size, dilation=dilation)
    out = jax.block_until_ready(out)

    ref = sliding_attn_reference(x, mask, params, num_heads=num_heads,
                                 window_size=window_size, dilation=dilation)
    np.testing.assert_allclose(np.asarray(out), np.asarray(ref),
                               rtol=2e-3, atol=2e-3)
    print("KERNEL_OK")
</pallas_src>

<mosaic_0001>
module attributes {stable_mosaic.version = 11 : i64} {
  func.func @kernel(%arg0: i32, %arg1: memref<2x16x32xf32, #tpu.memory_space<vmem>>, %arg2: memref<2x16x1xf32, #tpu.memory_space<vmem>>, %arg3: memref<4x32xf32, #tpu.memory_space<vmem>>, %arg4: memref<24x192xf32, #tpu.memory_space<vmem>>, %arg5: memref<32x4xf32, #tpu.memory_space<vmem>>, %arg6: memref<1x4xf32, #tpu.memory_space<vmem>>, %arg7: memref<32x32xf32, #tpu.memory_space<vmem>>, %arg8: memref<1x32xf32, #tpu.memory_space<vmem>>, %arg9: memref<1x32xf32, #tpu.memory_space<vmem>>, %arg10: memref<1x32xf32, #tpu.memory_space<vmem>>, %arg11: memref<32x4xf32, #tpu.memory_space<vmem>>, %arg12: memref<1x4xf32, #tpu.memory_space<vmem>>, %arg13: memref<1x4xf32, #tpu.memory_space<vmem>>, %arg14: memref<1x4xf32, #tpu.memory_space<vmem>>, %arg15: memref<4x24xf32, #tpu.memory_space<vmem>>, %arg16: memref<1x24xf32, #tpu.memory_space<vmem>>, %arg17: memref<32x32xf32, #tpu.memory_space<vmem>>, %arg18: memref<1x32xf32, #tpu.memory_space<vmem>>, %arg19: memref<1x32xf32, #tpu.memory_space<vmem>>, %arg20: memref<1x32xf32, #tpu.memory_space<vmem>>, %arg21: memref<2x16x32xf32, #tpu.memory_space<vmem>>) attributes {dimension_semantics = [#tpu.dimension_semantics<parallel>], iteration_bounds = array<i64: 1>, scalar_prefetch = 0 : i64, scratch_operands = 0 : i64, tpu.core_type = #tpu.core_type<tc>, window_params = [{transform_indices = @transform_0, window_bounds = array<i64: 2, 16, 32>}, {transform_indices = @transform_1, window_bounds = array<i64: 2, 16, 1>}, {pipeline_mode = #tpu.pipeline_mode<synchronous>, transform_indices = @transform_2, window_bounds = array<i64: 4, 32>}, {pipeline_mode = #tpu.pipeline_mode<synchronous>, transform_indices = @transform_3, window_bounds = array<i64: 24, 192>}, {pipeline_mode = #tpu.pipeline_mode<synchronous>, transform_indices = @transform_4, window_bounds = array<i64: 32, 4>}, {pipeline_mode = #tpu.pipeline_mode<synchronous>, transform_indices = @transform_5, window_bounds = array<i64: 1, 4>}, {pipeline_mode = #tpu.pipeline_mode<synchronous>, transform_indices = @transform_6, window_bounds = array<i64: 32, 32>}, {pipeline_mode = #tpu.pipeline_mode<synchronous>, transform_indices = @transform_7, window_bounds = array<i64: 1, 32>}, {pipeline_mode = #tpu.pipeline_mode<synchronous>, transform_indices = @transform_8, window_bounds = array<i64: 1, 32>}, {pipeline_mode = #tpu.pipeline_mode<synchronous>, transform_indices = @transform_9, window_bounds = array<i64: 1, 32>}, {pipeline_mode = #tpu.pipeline_mode<synchronous>, transform_indices = @transform_10, window_bounds = array<i64: 32, 4>}, {pipeline_mode = #tpu.pipeline_mode<synchronous>, transform_indices = @transform_11, window_bounds = array<i64: 1, 4>}, {pipeline_mode = #tpu.pipeline_mode<synchronous>, transform_indices = @transform_12, window_bounds = array<i64: 1, 4>}, {pipeline_mode = #tpu.pipeline_mode<synchronous>, transform_indices = @transform_13, window_bounds = array<i64: 1, 4>}, {pipeline_mode = #tpu.pipeline_mode<synchronous>, transform_indices = @transform_14, window_bounds = array<i64: 4, 24>}, {pipeline_mode = #tpu.pipeline_mode<synchronous>, transform_indices = @transform_15, window_bounds = array<i64: 1, 24>}, {pipeline_mode = #tpu.pipeline_mode<synchronous>, transform_indices = @transform_16, window_bounds = array<i64: 32, 32>}, {pipeline_mode = #tpu.pipeline_mode<synchronous>, transform_indices = @transform_17, window_bounds = array<i64: 1, 32>}, {pipeline_mode = #tpu.pipeline_mode<synchronous>, transform_indices = @transform_18, window_bounds = array<i64: 1, 32>}, {pipeline_mode = #tpu.pipeline_mode<synchronous>, transform_indices = @transform_19, window_bounds = array<i64: 1, 32>}, {transform_indices = @transform_20, window_bounds = array<i64: 2, 16, 32>}]} {
    %c0 = arith.constant 0 : index
    %c0_0 = arith.constant 0 : index
    %c0_1 = arith.constant 0 : index
    %0 = vector.load %arg1[%c0, %c0_0, %c0_1] : memref<2x16x32xf32, #tpu.memory_space<vmem>>, vector<2x16x32xf32>
    %1 = vector.shape_cast %0 : vector<2x16x32xf32> to vector<32x32xf32>
    %c0_2 = arith.constant 0 : index
    %c0_3 = arith.constant 0 : index
    %c0_4 = arith.constant 0 : index
    %2 = vector.load %arg2[%c0_2, %c0_3, %c0_4] : memref<2x16x1xf32, #tpu.memory_space<vmem>>, vector<2x16x1xf32>
    %3 = vector.shape_cast %2 : vector<2x16x1xf32> to vector<32x1xf32>
    %c0_5 = arith.constant 0 : index
    %c0_6 = arith.constant 0 : index
    %4 = vector.load %arg5[%c0_5, %c0_6] : memref<32x4xf32, #tpu.memory_space<vmem>>, vector<32x4xf32>
    %cst = arith.constant dense<0.000000e+00> : vector<32x4xf32>
    %5 = tpu.matmul %1, %4, %cst {dimension_numbers = #tpu.dot_dimension_numbers<[1], [0], [0], [1], [0, 0, 1, 1], [], []>, precision = #tpu.contract_precision<fp32>} : vector<32x32xf32>, vector<32x4xf32>, vector<32x4xf32> -> vector<32x4xf32>
    %c0_7 = arith.constant 0 : index
    %c0_8 = arith.constant 0 : index
    %6 = vector.load %arg6[%c0_7, %c0_8] : memref<1x4xf32, #tpu.memory_space<vmem>>, vector<1x4xf32>
    %7 = vector.broadcast %6 : vector<1x4xf32> to vector<32x4xf32>
    %8 = arith.addf %5, %7 : vector<32x4xf32>
    %9 = math.exp %8 : vector<32x4xf32>
    %10 = vector.broadcast %3 : vector<32x1xf32> to vector<32x4xf32>
    %11 = arith.mulf %9, %10 : vector<32x4xf32>
    %c0_9 = arith.constant 0 : index
    %c0_10 = arith.constant 0 : index
    %12 = vector.load %arg7[%c0_9, %c0_10] : memref<32x32xf32, #tpu.memory_space<vmem>>, vector<32x32xf32>
    %cst_11 = arith.constant dense<0.000000e+00> : vector<32x32xf32>
    %13 = tpu.matmul %1, %12, %cst_11 {dimension_numbers = #tpu.dot_dimension_numbers<[1], [0], [0], [1], [0, 0, 1, 1], [], []>, precision = #tpu.contract_precision<fp32>} : vector<32x32xf32>, vector<32x32xf32>, vector<32x32xf32> -> vector<32x32xf32>
    %c0_12 = arith.constant 0 : index
    %c0_13 = arith.constant 0 : index
    %14 = vector.load %arg8[%c0_12, %c0_13] : memref<1x32xf32, #tpu.memory_space<vmem>>, vector<1x32xf32>
    %15 = vector.broadcast %14 : vector<1x32xf32> to vector<32x32xf32>
    %16 = arith.addf %13, %15 : vector<32x32xf32>
    %c0_14 = arith.constant 0 : index
    %c0_15 = arith.constant 0 : index
    %17 = vector.load %arg9[%c0_14, %c0_15] : memref<1x32xf32, #tpu.memory_space<vmem>>, vector<1x32xf32>
    %c0_16 = arith.constant 0 : index
    %c0_17 = arith.constant 0 : index
    %18 = vector.load %arg10[%c0_16, %c0_17] : memref<1x32xf32, #tpu.memory_space<vmem>>, vector<1x32xf32>
    %cst_18 = arith.constant dense<0.000000e+00> : vector<32xf32>
    %19 = vector.multi_reduction <add>, %16, %cst_18 [1] : vector<32x32xf32> to vector<32xf32>
    %20 = vector.shape_cast %19 : vector<32xf32> to vector<32x1xf32>
    %cst_19 = arith.constant 3.200000e+01 : f32
    %21 = vector.broadcast %cst_19 : f32 to vector<32x1xf32>
    %22 = arith.divf %20, %21 : vector<32x1xf32>
    %23 = vector.broadcast %22 : vector<32x1xf32> to vector<32x32xf32>
    %24 = arith.subf %16, %23 : vector<32x32xf32>
    %25 = arith.mulf %24, %24 : vector<32x32xf32>
    %cst_20 = arith.constant dense<0.000000e+00> : vector<32xf32>
    %26 = vector.multi_reduction <add>, %25, %cst_20 [1] : vector<32x32xf32> to vector<32xf32>
    %27 = vector.shape_cast %26 : vector<32xf32> to vector<32x1xf32>
    %cst_21 = arith.constant 3.200000e+01 : f32
    %28 = vector.broadcast %cst_21 : f32 to vector<32x1xf32>
    %29 = arith.divf %27, %28 : vector<32x1xf32>
    %30 = vector.broadcast %22 : vector<32x1xf32> to vector<32x32xf32>
    %31 = arith.subf %16, %30 : vector<32x32xf32>
    %cst_22 = arith.constant 9.99999974E-6 : f32
    %32 = vector.broadcast %cst_22 : f32 to vector<32x1xf32>
    %33 = arith.addf %29, %32 : vector<32x1xf32>
    %34 = math.rsqrt %33 : vector<32x1xf32>
    %35 = vector.broadcast %34 : vector<32x1xf32> to vector<32x32xf32>
    %36 = arith.mulf %31, %35 : vector<32x32xf32>
    %37 = vector.broadcast %17 : vector<1x32xf32> to vector<32x32xf32>
    %38 = arith.mulf %36, %37 : vector<32x32xf32>
    %39 = vector.broadcast %18 : vector<1x32xf32> to vector<32x32xf32>
    %40 = arith.addf %38, %39 : vector<32x32xf32>
    %cst_23 = arith.constant 0.000000e+00 : f32
    %41 = vector.broadcast %cst_23 : f32 to vector<32x32xf32>
    %42 = arith.cmpf ogt, %40, %41 : vector<32x32xf32>
    %43 = math.exp %40 : vector<32x32xf32>
    %cst_24 = arith.constant 1.000000e+00 : f32
    %44 = vector.broadcast %cst_24 : f32 to vector<32x32xf32>
    %45 = arith.subf %43, %44 : vector<32x32xf32>
    %46 = arith.select %42, %40, %45 : vector<32x32xi1>, vector<32x32xf32>
    %c0_25 = arith.constant 0 : index
    %c0_26 = arith.constant 0 : index
    %47 = vector.load %arg3[%c0_25, %c0_26] : memref<4x32xf32, #tpu.memory_space<vmem>>, vector<4x32xf32>
    %cst_27 = arith.constant dense<0.000000e+00> : vector<32x32xf32>
    %48 = tpu.matmul %11, %47, %cst_27 {dimension_numbers = #tpu.dot_dimension_numbers<[1], [0], [0], [1], [0, 0, 1, 1], [], []>, precision = #tpu.contract_precision<fp32>} : vector<32x4xf32>, vector<4x32xf32>, vector<32x32xf32> -> vector<32x32xf32>
    %49 = vector.shape_cast %48 : vector<32x32xf32> to vector<2x16x32xf32>
    %50 = vector.shape_cast %46 : vector<32x32xf32> to vector<2x16x32xf32>
    %cst_28 = arith.constant dense<0.000000e+00> : vector<2x32xf32>
    %51 = vector.multi_reduction <add>, %49, %cst_28 [1] : vector<2x16x32xf32> to vector<2x32xf32>
    %cst_29 = arith.constant 9.99999974E-6 : f32
    %52 = vector.broadcast %cst_29 : f32 to vector<2x32xf32>
    %53 = arith.addf %51, %52 : vector<2x32xf32>
    %cst_30 = arith.constant 1.000000e+00 : f32
    %54 = vector.broadcast %cst_30 : f32 to vector<2x32xf32>
    %55 = arith.divf %54, %53 : vector<2x32xf32>
    %56 = arith.mulf %49, %50 : vector<2x16x32xf32>
    %cst_31 = arith.constant dense<0.000000e+00> : vector<2x32xf32>
    %57 = vector.multi_reduction <add>, %56, %cst_31 [1] : vector<2x16x32xf32> to vector<2x32xf32>
    %58 = arith.mulf %57, %55 : vector<2x32xf32>
    %c0_32 = arith.constant 0 : index
    %c0_33 = arith.constant 0 : index
    %59 = vector.load %arg11[%c0_32, %c0_33] : memref<32x4xf32, #tpu.memory_space<vmem>>, vector<32x4xf32>
    %cst_34 = arith.constant dense<0.000000e+00> : vector<2x4xf32>
    %60 = tpu.matmul %58, %59, %cst_34 {dimension_numbers = #tpu.dot_dimension_numbers<[1], [0], [0], [1], [0, 0, 1, 1], [], []>, precision = #tpu.contract_precision<fp32>} : vector<2x32xf32>, vector<32x4xf32>, vector<2x4xf32> -> vector<2x4xf32>
    %c0_35 = arith.constant 0 : index
    %c0_36 = arith.constant 0 : index
    %61 = vector.load %arg12[%c0_35, %c0_36] : memref<1x4xf32, #tpu.memory_space<vmem>>, vector<1x4xf32>
    %62 = vector.broadcast %61 : vector<1x4xf32> to vector<2x4xf32>
    %63 = arith.addf %60, %62 : vector<2x4xf32>
    %c0_37 = arith.constant 0 : index
    %c0_38 = arith.constant 0 : index
    %64 = vector.load %arg13[%c0_37, %c0_38] : memref<1x4xf32, #tpu.memory_space<vmem>>, vector<1x4xf32>
    %c0_39 = arith.constant 0 : index
    %c0_40 = arith.constant 0 : index
    %65 = vector.load %arg14[%c0_39, %c0_40] : memref<1x4xf32, #tpu.memory_space<vmem>>, vector<1x4xf32>
    %cst_41 = arith.constant dense<0.000000e+00> : vector<2xf32>
    %66 = vector.multi_reduction <add>, %63, %cst_41 [1] : vector<2x4xf32> to vector<2xf32>
    %67 = vector.shape_cast %66 : vector<2xf32> to vector<2x1xf32>
    %cst_42 = arith.constant 4.000000e+00 : f32
    %68 = vector.broadcast %cst_42 : f32 to vector<2x1xf32>
    %69 = arith.divf %67, %68 : vector<2x1xf32>
    %70 = vector.broadcast %69 : vector<2x1xf32> to vector<2x4xf32>
    %71 = arith.subf %63, %70 : vector<2x4xf32>
    %72 = arith.mulf %71, %71 : vector<2x4xf32>
    %cst_43 = arith.constant dense<0.000000e+00> : vector<2xf32>
    %73 = vector.multi_reduction <add>, %72, %cst_43 [1] : vector<2x4xf32> to vector<2xf32>
    %74 = vector.shape_cast %73 : vector<2xf32> to vector<2x1xf32>
    %cst_44 = arith.constant 4.000000e+00 : f32
    %75 = vector.broadcast %cst_44 : f32 to vector<2x1xf32>
    %76 = arith.divf %74, %75 : vector<2x1xf32>
    %77 = vector.broadcast %69 : vector<2x1xf32> to vector<2x4xf32>
    %78 = arith.subf %63, %77 : vector<2x4xf32>
    %cst_45 = arith.constant 9.99999974E-6 : f32
    %79 = vector.broadcast %cst_45 : f32 to vector<2x1xf32>
    %80 = arith.addf %76, %79 : vector<2x1xf32>
    %81 = math.rsqrt %80 : vector<2x1xf32>
    %82 = vector.broadcast %81 : vector<2x1xf32> to vector<2x4xf32>
    %83 = arith.mulf %78, %82 : vector<2x4xf32>
    %84 = vector.broadcast %64 : vector<1x4xf32> to vector<2x4xf32>
    %85 = arith.mulf %83, %84 : vector<2x4xf32>
    %86 = vector.broadcast %65 : vector<1x4xf32> to vector<2x4xf32>
    %87 = arith.addf %85, %86 : vector<2x4xf32>
    %cst_46 = arith.constant 0.000000e+00 : f32
    %88 = vector.broadcast %cst_46 : f32 to vector<2x4xf32>
    %89 = arith.cmpf ogt, %87, %88 : vector<2x4xf32>
    %90 = math.exp %87 : vector<2x4xf32>
    %cst_47 = arith.constant 1.000000e+00 : f32
    %91 = vector.broadcast %cst_47 : f32 to vector<2x4xf32>
    %92 = arith.subf %90, %91 : vector<2x4xf32>
    %93 = arith.select %89, %87, %92 : vector<2x4xi1>, vector<2x4xf32>
    %c0_48 = arith.constant 0 : index
    %c0_49 = arith.constant 0 : index
    %94 = vector.load %arg15[%c0_48, %c0_49] : memref<4x24xf32, #tpu.memory_space<vmem>>, vector<4x24xf32>
    %cst_50 = arith.constant dense<0.000000e+00> : vector<2x24xf32>
    %95 = tpu.matmul %93, %94, %cst_50 {dimension_numbers = #tpu.dot_dimension_numbers<[1], [0], [0], [1], [0, 0, 1, 1], [], []>, precision = #tpu.contract_precision<fp32>} : vector<2x4xf32>, vector<4x24xf32>, vector<2x24xf32> -> vector<2x24xf32>
    %c0_51 = arith.constant 0 : index
    %c0_52 = arith.constant 0 : index
    %96 = vector.load %arg16[%c0_51, %c0_52] : memref<1x24xf32, #tpu.memory_space<vmem>>, vector<1x24xf32>
    %97 = vector.broadcast %96 : vector<1x24xf32> to vector<2x24xf32>
    %98 = arith.addf %95, %97 : vector<2x24xf32>
    %99 = math.exp %98 : vector<2x24xf32>
    %c0_53 = arith.constant 0 : index
    %c0_54 = arith.constant 0 : index
    %100 = vector.load %arg4[%c0_53, %c0_54] : memref<24x192xf32, #tpu.memory_space<vmem>>, vector<24x192xf32>
    %cst_55 = arith.constant dense<0.000000e+00> : vector<2x192xf32>
    %101 = tpu.matmul %99, %100, %cst_55 {dimension_numbers = #tpu.dot_dimension_numbers<[1], [0], [0], [1], [0, 0, 1, 1], [], []>, precision = #tpu.contract_precision<fp32>} : vector<2x24xf32>, vector<24x192xf32>, vector<2x192xf32> -> vector<2x192xf32>
    %102 = vector.extract_strided_slice %101 {offsets = [0, 0], sizes = [2, 32], strides = [1, 1]} : vector<2x192xf32> to vector<2x32xf32>
    %103 = vector.shape_cast %102 : vector<2x32xf32> to vector<2x1x32xf32>
    %104 = vector.shape_cast %58 : vector<2x32xf32> to vector<2x1x32xf32>
    %105 = tpu.iota {dimensions = array<i32: 0>} : vector<16x1xi32>
    %106 = vector.extract_strided_slice %101 {offsets = [0, 32], sizes = [2, 32], strides = [1, 1]} : vector<2x192xf32> to vector<2x32xf32>
    %107 = vector.shape_cast %106 : vector<2x32xf32> to vector<2x1x32xf32>
    %c-2_i32 = arith.constant -2 : i32
    %108 = vector.broadcast %c-2_i32 : i32 to vector<16x1xi32>
    %109 = arith.addi %105, %108 : vector<16x1xi32>
    %c0_i32 = arith.constant 0 : i32
    %110 = vector.broadcast %c0_i32 : i32 to vector<16x1xi32>
    %111 = arith.cmpi sge, %109, %110 : vector<16x1xi32>
    %c-2_i32_56 = arith.constant -2 : i32
    %112 = vector.broadcast %c-2_i32_56 : i32 to vector<16x1xi32>
    %113 = arith.addi %105, %112 : vector<16x1xi32>
    %c16_i32 = arith.constant 16 : i32
    %114 = vector.broadcast %c16_i32 : i32 to vector<16x1xi32>
    %115 = arith.cmpi slt, %113, %114 : vector<16x1xi32>
    %116 = arith.andi %111, %115 : vector<16x1xi1>
    %117 = arith.extui %116 : vector<16x1xi1> to vector<16x1xi32>
    %118 = arith.sitofp %117 : vector<16x1xi32> to vector<16x1xf32>
    %c2_i32 = arith.constant 2 : i32
    %119 = tpu.dynamic_rotate %48 by %c2_i32 dim 0 : vector<32x32xf32>, i32 -> vector<32x32xf32>
    %120 = vector.shape_cast %119 : vector<32x32xf32> to vector<2x16x32xf32>
    %121 = vector.shape_cast %118 : vector<16x1xf32> to vector<1x16x1xf32>
    %122 = vector.broadcast %121 : vector<1x16x1xf32> to vector<2x16x32xf32>
    %123 = arith.mulf %120, %122 : vector<2x16x32xf32>
    %c2_i32_57 = arith.constant 2 : i32
    %124 = tpu.dynamic_rotate %46 by %c2_i32_57 dim 0 : vector<32x32xf32>, i32 -> vector<32x32xf32>
    %125 = vector.shape_cast %124 : vector<32x32xf32> to vector<2x16x32xf32>
    %126 = vector.broadcast %107 : vector<2x1x32xf32> to vector<2x16x32xf32>
    %127 = arith.mulf %123, %126 : vector<2x16x32xf32>
    %128 = arith.mulf %127, %125 : vector<2x16x32xf32>
    %129 = vector.extract_strided_slice %101 {offsets = [0, 64], sizes = [2, 32], strides = [1, 1]} : vector<2x192xf32> to vector<2x32xf32>
    %130 = vector.shape_cast %129 : vector<2x32xf32> to vector<2x1x32xf32>
    %c-1_i32 = arith.constant -1 : i32
    %131 = vector.broadcast %c-1_i32 : i32 to vector<16x1xi32>
    %132 = arith.addi %105, %131 : vector<16x1xi32>
    %c0_i32_58 = arith.constant 0 : i32
    %133 = vector.broadcast %c0_i32_58 : i32 to vector<16x1xi32>
    %134 = arith.cmpi sge, %132, %133 : vector<16x1xi32>
    %c-1_i32_59 = arith.constant -1 : i32
    %135 = vector.broadcast %c-1_i32_59 : i32 to vector<16x1xi32>
    %136 = arith.addi %105, %135 : vector<16x1xi32>
    %c16_i32_60 = arith.constant 16 : i32
    %137 = vector.broadcast %c16_i32_60 : i32 to vector<16x1xi32>
    %138 = arith.cmpi slt, %136, %137 : vector<16x1xi32>
    %139 = arith.andi %134, %138 : vector<16x1xi1>
    %140 = arith.extui %139 : vector<16x1xi1> to vector<16x1xi32>
    %141 = arith.sitofp %140 : vector<16x1xi32> to vector<16x1xf32>
    %c1_i32 = arith.constant 1 : i32
    %142 = tpu.dynamic_rotate %48 by %c1_i32 dim 0 : vector<32x32xf32>, i32 -> vector<32x32xf32>
    %143 = vector.shape_cast %142 : vector<32x32xf32> to vector<2x16x32xf32>
    %144 = vector.shape_cast %141 : vector<16x1xf32> to vector<1x16x1xf32>
    %145 = vector.broadcast %144 : vector<1x16x1xf32> to vector<2x16x32xf32>
    %146 = arith.mulf %143, %145 : vector<2x16x32xf32>
    %c1_i32_61 = arith.constant 1 : i32
    %147 = tpu.dynamic_rotate %46 by %c1_i32_61 dim 0 : vector<32x32xf32>, i32 -> vector<32x32xf32>
    %148 = vector.shape_cast %147 : vector<32x32xf32> to vector<2x16x32xf32>
    %149 = vector.broadcast %130 : vector<2x1x32xf32> to vector<2x16x32xf32>
    %150 = arith.mulf %146, %149 : vector<2x16x32xf32>
    %151 = arith.addf %127, %150 : vector<2x16x32xf32>
    %152 = arith.mulf %150, %148 : vector<2x16x32xf32>
    %153 = arith.addf %128, %152 : vector<2x16x32xf32>
    %154 = vector.extract_strided_slice %101 {offsets = [0, 96], sizes = [2, 32], strides = [1, 1]} : vector<2x192xf32> to vector<2x32xf32>
    %155 = vector.shape_cast %154 : vector<2x32xf32> to vector<2x1x32xf32>
    %156 = vector.broadcast %155 : vector<2x1x32xf32> to vector<2x16x32xf32>
    %157 = arith.mulf %49, %156 : vector<2x16x32xf32>
    %158 = arith.addf %151, %157 : vector<2x16x32xf32>
    %159 = arith.mulf %157, %50 : vector<2x16x32xf32>
    %160 = arith.addf %153, %159 : vector<2x16x32xf32>
    %161 = vector.extract_strided_slice %101 {offsets = [0, 128], sizes = [2, 32], strides = [1, 1]} : vector<2x192xf32> to vector<2x32xf32>
    %162 = vector.shape_cast %161 : vector<2x32xf32> to vector<2x1x32xf32>
    %c1_i32_62 = arith.constant 1 : i32
    %163 = vector.broadcast %c1_i32_62 : i32 to vector<16x1xi32>
    %164 = arith.addi %105, %163 : vector<16x1xi32>
    %c0_i32_63 = arith.constant 0 : i32
    %165 = vector.broadcast %c0_i32_63 : i32 to vector<16x1xi32>
    %166 = arith.cmpi sge, %164, %165 : vector<16x1xi32>
    %c1_i32_64 = arith.constant 1 : i32
    %167 = vector.broadcast %c1_i32_64 : i32 to vector<16x1xi32>
    %168 = arith.addi %105, %167 : vector<16x1xi32>
    %c16_i32_65 = arith.constant 16 : i32
    %169 = vector.broadcast %c16_i32_65 : i32 to vector<16x1xi32>
    %170 = arith.cmpi slt, %168, %169 : vector<16x1xi32>
    %171 = arith.andi %166, %170 : vector<16x1xi1>
    %172 = arith.extui %171 : vector<16x1xi1> to vector<16x1xi32>
    %173 = arith.sitofp %172 : vector<16x1xi32> to vector<16x1xf32>
    %c31_i32 = arith.constant 31 : i32
    %174 = tpu.dynamic_rotate %48 by %c31_i32 dim 0 : vector<32x32xf32>, i32 -> vector<32x32xf32>
    %175 = vector.shape_cast %174 : vector<32x32xf32> to vector<2x16x32xf32>
    %176 = vector.shape_cast %173 : vector<16x1xf32> to vector<1x16x1xf32>
    %177 = vector.broadcast %176 : vector<1x16x1xf32> to vector<2x16x32xf32>
    %178 = arith.mulf %175, %177 : vector<2x16x32xf32>
    %c31_i32_66 = arith.constant 31 : i32
    %179 = tpu.dynamic_rotate %46 by %c31_i32_66 dim 0 : vector<32x32xf32>, i32 -> vector<32x32xf32>
    %180 = vector.shape_cast %179 : vector<32x32xf32> to vector<2x16x32xf32>
    %181 = vector.broadcast %162 : vector<2x1x32xf32> to vector<2x16x32xf32>
    %182 = arith.mulf %178, %181 : vector<2x16x32xf32>
    %183 = arith.addf %158, %182 : vector<2x16x32xf32>
    %184 = arith.mulf %182, %180 : vector<2x16x32xf32>
    %185 = arith.addf %160, %184 : vector<2x16x32xf32>
    %186 = vector.extract_strided_slice %101 {offsets = [0, 160], sizes = [2, 32], strides = [1, 1]} : vector<2x192xf32> to vector<2x32xf32>
    %187 = vector.shape_cast %186 : vector<2x32xf32> to vector<2x1x32xf32>
    %c2_i32_67 = arith.constant 2 : i32
    %188 = vector.broadcast %c2_i32_67 : i32 to vector<16x1xi32>
    %189 = arith.addi %105, %188 : vector<16x1xi32>
    %c0_i32_68 = arith.constant 0 : i32
    %190 = vector.broadcast %c0_i32_68 : i32 to vector<16x1xi32>
    %191 = arith.cmpi sge, %189, %190 : vector<16x1xi32>
    %c2_i32_69 = arith.constant 2 : i32
    %192 = vector.broadcast %c2_i32_69 : i32 to vector<16x1xi32>
    %193 = arith.addi %105, %192 : vector<16x1xi32>
    %c16_i32_70 = arith.constant 16 : i32
    %194 = vector.broadcast %c16_i32_70 : i32 to vector<16x1xi32>
    %195 = arith.cmpi slt, %193, %194 : vector<16x1xi32>
    %196 = arith.andi %191, %195 : vector<16x1xi1>
    %197 = arith.extui %196 : vector<16x1xi1> to vector<16x1xi32>
    %198 = arith.sitofp %197 : vector<16x1xi32> to vector<16x1xf32>
    %c30_i32 = arith.constant 30 : i32
    %199 = tpu.dynamic_rotate %48 by %c30_i32 dim 0 : vector<32x32xf32>, i32 -> vector<32x32xf32>
    %200 = vector.shape_cast %199 : vector<32x32xf32> to vector<2x16x32xf32>
    %201 = vector.shape_cast %198 : vector<16x1xf32> to vector<1x16x1xf32>
    %202 = vector.broadcast %201 : vector<1x16x1xf32> to vector<2x16x32xf32>
    %203 = arith.mulf %200, %202 : vector<2x16x32xf32>
    %c30_i32_71 = arith.constant 30 : i32
    %204 = tpu.dynamic_rotate %46 by %c30_i32_71 dim 0 : vector<32x32xf32>, i32 -> vector<32x32xf32>
    %205 = vector.shape_cast %204 : vector<32x32xf32> to vector<2x16x32xf32>
    %206 = vector.broadcast %187 : vector<2x1x32xf32> to vector<2x16x32xf32>
    %207 = arith.mulf %203, %206 : vector<2x16x32xf32>
    %208 = arith.addf %183, %207 : vector<2x16x32xf32>
    %209 = arith.mulf %207, %205 : vector<2x16x32xf32>
    %210 = arith.addf %185, %209 : vector<2x16x32xf32>
    %211 = arith.mulf %103, %104 : vector<2x1x32xf32>
    %212 = vector.broadcast %211 : vector<2x1x32xf32> to vector<2x16x32xf32>
    %213 = arith.addf %210, %212 : vector<2x16x32xf32>
    %214 = vector.broadcast %103 : vector<2x1x32xf32> to vector<2x16x32xf32>
    %215 = arith.addf %208, %214 : vector<2x16x32xf32>
    %cst_72 = arith.constant 9.99999974E-6 : f32
    %216 = vector.broadcast %cst_72 : f32 to vector<2x16x32xf32>
    %217 = arith.addf %215, %216 : vector<2x16x32xf32>
    %218 = arith.divf %213, %217 : vector<2x16x32xf32>
    %219 = vector.shape_cast %218 : vector<2x16x32xf32> to vector<32x32xf32>
    %c0_73 = arith.constant 0 : index
    %c0_74 = arith.constant 0 : index
    %220 = vector.load %arg17[%c0_73, %c0_74] : memref<32x32xf32, #tpu.memory_space<vmem>>, vector<32x32xf32>
    %cst_75 = arith.constant dense<0.000000e+00> : vector<32x32xf32>
    %221 = tpu.matmul %219, %220, %cst_75 {dimension_numbers = #tpu.dot_dimension_numbers<[1], [0], [0], [1], [0, 0, 1, 1], [], []>, precision = #tpu.contract_precision<fp32>} : vector<32x32xf32>, vector<32x32xf32>, vector<32x32xf32> -> vector<32x32xf32>
    %c0_76 = arith.constant 0 : index
    %c0_77 = arith.constant 0 : index
    %222 = vector.load %arg18[%c0_76, %c0_77] : memref<1x32xf32, #tpu.memory_space<vmem>>, vector<1x32xf32>
    %223 = vector.broadcast %222 : vector<1x32xf32> to vector<32x32xf32>
    %224 = arith.addf %221, %223 : vector<32x32xf32>
    %c0_78 = arith.constant 0 : index
    %c0_79 = arith.constant 0 : index
    %225 = vector.load %arg19[%c0_78, %c0_79] : memref<1x32xf32, #tpu.memory_space<vmem>>, vector<1x32xf32>
    %c0_80 = arith.constant 0 : index
    %c0_81 = arith.constant 0 : index
    %226 = vector.load %arg20[%c0_80, %c0_81] : memref<1x32xf32, #tpu.memory_space<vmem>>, vector<1x32xf32>
    %cst_82 = arith.constant dense<0.000000e+00> : vector<32xf32>
    %227 = vector.multi_reduction <add>, %224, %cst_82 [1] : vector<32x32xf32> to vector<32xf32>
    %228 = vector.shape_cast %227 : vector<32xf32> to vector<32x1xf32>
    %cst_83 = arith.constant 3.200000e+01 : f32
    %229 = vector.broadcast %cst_83 : f32 to vector<32x1xf32>
    %230 = arith.divf %228, %229 : vector<32x1xf32>
    %231 = vector.broadcast %230 : vector<32x1xf32> to vector<32x32xf32>
    %232 = arith.subf %224, %231 : vector<32x32xf32>
    %233 = arith.mulf %232, %232 : vector<32x32xf32>
    %cst_84 = arith.constant dense<0.000000e+00> : vector<32xf32>
    %234 = vector.multi_reduction <add>, %233, %cst_84 [1] : vector<32x32xf32> to vector<32xf32>
    %235 = vector.shape_cast %234 : vector<32xf32> to vector<32x1xf32>
    %cst_85 = arith.constant 3.200000e+01 : f32
    %236 = vector.broadcast %cst_85 : f32 to vector<32x1xf32>
    %237 = arith.divf %235, %236 : vector<32x1xf32>
    %238 = vector.broadcast %230 : vector<32x1xf32> to vector<32x32xf32>
    %239 = arith.subf %224, %238 : vector<32x32xf32>
    %cst_86 = arith.constant 9.99999974E-6 : f32
    %240 = vector.broadcast %cst_86 : f32 to vector<32x1xf32>
    %241 = arith.addf %237, %240 : vector<32x1xf32>
    %242 = math.rsqrt %241 : vector<32x1xf32>
    %243 = vector.broadcast %242 : vector<32x1xf32> to vector<32x32xf32>
    %244 = arith.mulf %239, %243 : vector<32x32xf32>
    %245 = vector.broadcast %225 : vector<1x32xf32> to vector<32x32xf32>
    %246 = arith.mulf %244, %245 : vector<32x32xf32>
    %247 = vector.broadcast %226 : vector<1x32xf32> to vector<32x32xf32>
    %248 = arith.addf %246, %247 : vector<32x32xf32>
    %cst_87 = arith.constant 0.000000e+00 : f32
    %249 = vector.broadcast %cst_87 : f32 to vector<32x32xf32>
    %250 = arith.cmpf ogt, %248, %249 : vector<32x32xf32>
    %251 = math.exp %248 : vector<32x32xf32>
    %cst_88 = arith.constant 1.000000e+00 : f32
    %252 = vector.broadcast %cst_88 : f32 to vector<32x32xf32>
    %253 = arith.subf %251, %252 : vector<32x32xf32>
    %254 = arith.select %250, %248, %253 : vector<32x32xi1>, vector<32x32xf32>
    %255 = vector.shape_cast %254 : vector<32x32xf32> to vector<2x16x32xf32>
    %c0_89 = arith.constant 0 : index
    %c0_90 = arith.constant 0 : index
    %c0_91 = arith.constant 0 : index
    %256 = vector.load %arg21[%c0_89, %c0_90, %c0_91] : memref<2x16x32xf32, #tpu.memory_space<vmem>>, vector<2x16x32xf32>
    tpu.vector_store %arg21[%c0_89, %c0_90, %c0_91], %255 {strides = array<i32>} : memref<2x16x32xf32, #tpu.memory_space<vmem>>, vector<2x16x32xf32>,
    return
  }
  func.func @transform_0(%arg0: i32) -> (i32, i32, i32) {
    %c0_i32 = arith.constant 0 : i32
    %c0_i32_0 = arith.constant 0 : i32
    %c0_i32_1 = arith.constant 0 : i32
    return %arg0, %c0_i32, %c0_i32_0 : i32, i32, i32
  }
  func.func @transform_1(%arg0: i32) -> (i32, i32, i32) {
    %c0_i32 = arith.constant 0 : i32
    %c0_i32_0 = arith.constant 0 : i32
    %c0_i32_1 = arith.constant 0 : i32
    return %arg0, %c0_i32, %c0_i32_0 : i32, i32, i32
  }
  func.func @transform_2(%arg0: i32) -> (i32, i32) {
    %c0_i32 = arith.constant 0 : i32
    %c0_i32_0 = arith.constant 0 : i32
    %c0_i32_1 = arith.constant 0 : i32
    return %c0_i32, %c0_i32_0 : i32, i32
  }
  func.func @transform_3(%arg0: i32) -> (i32, i32) {
    %c0_i32 = arith.constant 0 : i32
    %c0_i32_0 = arith.constant 0 : i32
    %c0_i32_1 = arith.constant 0 : i32
    return %c0_i32, %c0_i32_0 : i32, i32
  }
  func.func @transform_4(%arg0: i32) -> (i32, i32) {
    %c0_i32 = arith.constant 0 : i32
    %c0_i32_0 = arith.constant 0 : i32
    %c0_i32_1 = arith.constant 0 : i32
    return %c0_i32, %c0_i32_0 : i32, i32
  }
  func.func @transform_5(%arg0: i32) -> (i32, i32) {
    %c0_i32 = arith.constant 0 : i32
    %c0_i32_0 = arith.constant 0 : i32
    %c0_i32_1 = arith.constant 0 : i32
    return %c0_i32, %c0_i32_0 : i32, i32
  }
  func.func @transform_6(%arg0: i32) -> (i32, i32) {
    %c0_i32 = arith.constant 0 : i32
    %c0_i32_0 = arith.constant 0 : i32
    %c0_i32_1 = arith.constant 0 : i32
    return %c0_i32, %c0_i32_0 : i32, i32
  }
  func.func @transform_7(%arg0: i32) -> (i32, i32) {
    %c0_i32 = arith.constant 0 : i32
    %c0_i32_0 = arith.constant 0 : i32
    %c0_i32_1 = arith.constant 0 : i32
    return %c0_i32, %c0_i32_0 : i32, i32
  }
  func.func @transform_8(%arg0: i32) -> (i32, i32) {
    %c0_i32 = arith.constant 0 : i32
    %c0_i32_0 = arith.constant 0 : i32
    %c0_i32_1 = arith.constant 0 : i32
    return %c0_i32, %c0_i32_0 : i32, i32
  }
  func.func @transform_9(%arg0: i32) -> (i32, i32) {
    %c0_i32 = arith.constant 0 : i32
    %c0_i32_0 = arith.constant 0 : i32
    %c0_i32_1 = arith.constant 0 : i32
    return %c0_i32, %c0_i32_0 : i32, i32
  }
  func.func @transform_10(%arg0: i32) -> (i32, i32) {
    %c0_i32 = arith.constant 0 : i32
    %c0_i32_0 = arith.constant 0 : i32
    %c0_i32_1 = arith.constant 0 : i32
    return %c0_i32, %c0_i32_0 : i32, i32
  }
  func.func @transform_11(%arg0: i32) -> (i32, i32) {
    %c0_i32 = arith.constant 0 : i32
    %c0_i32_0 = arith.constant 0 : i32
    %c0_i32_1 = arith.constant 0 : i32
    return %c0_i32, %c0_i32_0 : i32, i32
  }
  func.func @transform_12(%arg0: i32) -> (i32, i32) {
    %c0_i32 = arith.constant 0 : i32
    %c0_i32_0 = arith.constant 0 : i32
    %c0_i32_1 = arith.constant 0 : i32
    return %c0_i32, %c0_i32_0 : i32, i32
  }
  func.func @transform_13(%arg0: i32) -> (i32, i32) {
    %c0_i32 = arith.constant 0 : i32
    %c0_i32_0 = arith.constant 0 : i32
    %c0_i32_1 = arith.constant 0 : i32
    return %c0_i32, %c0_i32_0 : i32, i32
  }
  func.func @transform_14(%arg0: i32) -> (i32, i32) {
    %c0_i32 = arith.constant 0 : i32
    %c0_i32_0 = arith.constant 0 : i32
    %c0_i32_1 = arith.constant 0 : i32
    return %c0_i32, %c0_i32_0 : i32, i32
  }
  func.func @transform_15(%arg0: i32) -> (i32, i32) {
    %c0_i32 = arith.constant 0 : i32
    %c0_i32_0 = arith.constant 0 : i32
    %c0_i32_1 = arith.constant 0 : i32
    return %c0_i32, %c0_i32_0 : i32, i32
  }
  func.func @transform_16(%arg0: i32) -> (i32, i32) {
    %c0_i32 = arith.constant 0 : i32
    %c0_i32_0 = arith.constant 0 : i32
    %c0_i32_1 = arith.constant 0 : i32
    return %c0_i32, %c0_i32_0 : i32, i32
  }
  func.func @transform_17(%arg0: i32) -> (i32, i32) {
    %c0_i32 = arith.constant 0 : i32
    %c0_i32_0 = arith.constant 0 : i32
    %c0_i32_1 = arith.constant 0 : i32
    return %c0_i32, %c0_i32_0 : i32, i32
  }
  func.func @transform_18(%arg0: i32) -> (i32, i32) {
    %c0_i32 = arith.constant 0 : i32
    %c0_i32_0 = arith.constant 0 : i32
    %c0_i32_1 = arith.constant 0 : i32
    return %c0_i32, %c0_i32_0 : i32, i32
  }
  func.func @transform_19(%arg0: i32) -> (i32, i32) {
    %c0_i32 = arith.constant 0 : i32
    %c0_i32_0 = arith.constant 0 : i32
    %c0_i32_1 = arith.constant 0 : i32
    return %c0_i32, %c0_i32_0 : i32, i32
  }
  func.func @transform_20(%arg0: i32) -> (i32, i32, i32) {
    %c0_i32 = arith.constant 0 : i32
    %c0_i32_0 = arith.constant 0 : i32
    %c0_i32_1 = arith.constant 0 : i32
    return %arg0, %c0_i32, %c0_i32_0 : i32, i32, i32
  }
}

</mosaic_0001>

<bundles_post_ra>
// kernel: tpu_custom_call.1
= control target key start
LH: loop header
LB: loop body
LE: loop exit
PB: predicated region body
PF: predicated region fallthrough
CT: control target
= control target key end

     0   :  { %s3852_s0 = inlined_call_operand.vmem [shape: f32[2,16,32], index: 0, kind: input, shape index: {}]   ;;  %s3853_s1 = inlined_call_operand.vmem [shape: f32[2,16,1], index: 1, kind: input, shape index: {}]   ;;  %s3854_s2 = inlined_call_operand.vmem [shape: f32[4,32], index: 2, kind: input, shape index: {}]   ;;  %s3855_s3 = inlined_call_operand.vmem [shape: f32[24,192], index: 3, kind: input, shape index: {}]   ;;  %s3856_s4 = inlined_call_operand.vmem [shape: f32[32,4], index: 4, kind: input, shape index: {}]   ;;  %s3857_s5 = inlined_call_operand.vmem [shape: f32[1,4], index: 5, kind: input, shape index: {}]   ;;  %s3858_s6 = inlined_call_operand.hbm [shape: f32[32,32], index: 6, kind: input, shape index: {}]   ;;  %s3859_s7 = inlined_call_operand.vmem [shape: f32[1,32], index: 7, kind: input, shape index: {}]   ;;  %s3860_s8 = inlined_call_operand.vmem [shape: f32[1,32], index: 8, kind: input, shape index: {}]   ;;  %s3861_s9 = inlined_call_operand.vmem [shape: f32[1,32], index: 9, kind: input, shape index: {}]   ;;  %s3862_s10 = inlined_call_operand.vmem [shape: f32[32,4], index: 10, kind: input, shape index: {}]   ;;  %s3863_s11 = inlined_call_operand.vmem [shape: f32[1,4], index: 11, kind: input, shape index: {}]   ;;  %s3864_s12 = inlined_call_operand.vmem [shape: f32[1,4], index: 12, kind: input, shape index: {}]   ;;  %s3865_s13 = inlined_call_operand.vmem [shape: f32[1,4], index: 13, kind: input, shape index: {}]   ;;  %s3866_s14 = inlined_call_operand.vmem [shape: f32[4,24], index: 14, kind: input, shape index: {}]   ;;  %s3867_s15 = inlined_call_operand.vmem [shape: f32[1,24], index: 15, kind: input, shape index: {}]   ;;  %s3868_s16 = inlined_call_operand.hbm [shape: f32[32,32], index: 16, kind: input, shape index: {}]   ;;  %s3869_s17 = inlined_call_operand.vmem [shape: f32[1,32], index: 17, kind: input, shape index: {}]   ;;  %s3870_s18 = inlined_call_operand.vmem [shape: f32[1,32], index: 18, kind: input, shape index: {}]   ;;  %s3871_s19 = inlined_call_operand.vmem [shape: f32[1,32], index: 19, kind: input, shape index: {}]   ;;  %s3872_s20 = inlined_call_operand.hbm [shape: f32[2,16,32], index: 20, kind: output, shape index: {}]  }
   0x1   :  { %3882 = sst [smem:[#allocation11_spill]] %s3852_s0 }
   0x2   :  { %3883 = sst [smem:[#allocation12_spill]] %s3853_s1 }
   0x3   :  { %3884 = sst [smem:[#allocation13_spill]] %s3854_s2 }
   0x4   :  { %3885 = sst [smem:[#allocation14_spill]] %s3855_s3 }
   0x5   :  { %3886 = sst [smem:[#allocation15_spill]] %s3856_s4 }
   0x6   :  { %25 = vsyncpa [#allocation3], 0 }
   0x7   :  { %26 = vsyncpa [#allocation6], 0 }
   0x8   :  { %27 = vsyncpa [#allocation4], 0  ;;  %s44_s23 = sshll.u32 %s3858_s6, 4  ;;  %s2898_s24 = smov [#allocation2]   ;;  %s45_s23 = int_to_ptr.hbm [resolvable:$true] %s44_s23 }
   0x9   :  { %s46_s2 = sshll.u32 %s2898_s24, 4  ;;  %s75_s26 = sshll.u32 %s3868_s16, 4  ;;  %s47_s2 = int_to_ptr.vmem [resolvable:$true] %s46_s2  ;;  %s76_s26 = int_to_ptr.hbm [resolvable:$true] %s75_s26 }
   0xa   :  { %s2899_s27 = smov 128   ;;  %s2900_s28 = smov 8  }
   0xb   :  { %52 = dma.hbm_to_vmem [thread:$0]  %s45_s23, 512, %s47_s2, [#allocation3], %s2899_s27, %s2899_s27, %s2900_s28  }
   0xc   :  { %s2901_s4 = smov [#allocation5]  }
   0xd   :  { %s77_s29 = sshll.u32 %s2901_s4, 4  ;;  %s78_s29 = int_to_ptr.vmem [resolvable:$true] %s77_s29 }
   0xe   :  { %83 = dma.hbm_to_vmem [thread:$0]  %s76_s26, 512, %s78_s29, [#allocation6], %s2899_s27, %s2899_s27, %s2900_s28  }
   0xf   :  { %2892 = dma.done.wait [#allocation3], 512  }
  0x10   :  { %2893 = vsyncadd [#allocation3], 4294966784 }
  0x11   :  { %2894 = dma.done.wait [#allocation6], 512  }
  0x12   :  { %2895 = vsyncadd [#allocation6], 4294966784  ;;  %vm114_vm0 = vcmask 261120   ;;  %s3887_s30 = sld [smem:[#allocation15_spill]]  ;;  %v440_v13 = vld [vmem:[#allocation2 + $0x18] sm:$0xff]  ;;  %v439_v37 = vld [vmem:[#allocation2 + $0x10] sm:$0xff] }
  0x13   :  { %s3888_s3 = sld [smem:[#allocation11_spill]]  ;;  %v3071_v21 = vand.u32 4294901760, %v440_v13  ;;  %v3116_v47 = vand.u32 4294901760, %v439_v37  ;;  %v438_v53 = vld [vmem:[#allocation2 + $0x8] sm:$0xff]  ;;  %vm868_vm1 = vcmask 1043456   ;;  %vm855_vm2 = vcmask 31744  }
  0x14   :  { %v3134_v56 = vand.u32 4294901760, %v438_v53  ;;  %s3889_s1 = sld [smem:[#allocation12_spill]] }
  0x15   :  { %v3114_v46 = vsub.f32 %v440_v13, %v3071_v21  ;;  %v3127_v52 = vsub.f32 %v439_v37, %v3116_v47  ;;  %v2902_v13 = vmov 0   ;;  %s3890_s29 = sld [smem:[#allocation13_spill]] }
  0x16   :  { %v523_v61 = vsub.f32 %v438_v53, %v3134_v56  ;;  %2745 = vset.pattern.permute.xlu0 %v2902_v13  ;;  %2746 = vset.pattern.permute.xlu1 %v2902_v13 }
  0x17   :  { %v512_v57 = vand.u32 4294901760, %v3114_v46  ;;  %v518_v60 = vand.u32 4294901760, %v3127_v52 }
  0x18   :  { %v109_v0 = vld [vmem:[%s3887_s30 + $0x18] sm:$0xff]  ;;  %v108_v1 = vld [vmem:[%s3887_s30 + $0x10] sm:$0xff]  ;;  %v107_v2 = vld [vmem:[%s3887_s30 + $0x8] sm:$0xff] }
  0x19   :  { %v3036_v3 = vand.u32 4294901760, %v109_v0  ;;  %v3038_v4 = vand.u32 4294901760, %v108_v1  ;;  %v3040_v5 = vand.u32 4294901760, %v107_v2  ;;  %v106_v6 = vld [vmem:[%s3887_s30] sm:$0xff]  ;;  %v100_v7 = vld [vmem:[%s3888_s3 + $0x10] sm:$0xff]  ;;  %v101_v8 = vld [vmem:[%s3888_s3 + $0x18] sm:$0xff]  ;;  %v513_v62 = vsub.f32 %v3114_v46, %v512_v57 }
  0x1a   :  { %v3051_v9 = vand.u32 4294901760, %v106_v6  ;;  %v122_v10 = vsel %vm114_vm0, %v100_v7, 0  ;;  %v125_v11 = vsel %vm114_vm0, %v101_v8, 0  ;;  %v98_v12 = vld [vmem:[%s3888_s3] sm:$0xff]  ;;  %v99_v26 = vld [vmem:[%s3888_s3 + $0x8] sm:$0xff]  ;;  %s2906_s3 = smov 64  }
  0x1b   :  { %2725 = vmatpush.msra.mxu2 %v3036_v3  ;;  %v193_v14 = vsub.f32 %v109_v0, %v3036_v3  ;;  %v3060_v15 = vand.u32 4294901760, %v122_v10  ;;  %v199_v16 = vsub.f32 %v108_v1, %v3038_v4  ;;  %v205_v17 = vsub.f32 %v107_v2, %v3040_v5  ;;  %140 = vmatpush.msra.mxu0 %v3036_v3  ;;  %v437_v2 = vld [vmem:[#allocation2] sm:$0xff] }
  0x1c   :  { %v3066_v18 = vsub.f32 %v106_v6, %v3051_v9  ;;  %v3068_v19 = vand.u32 4294901760, %v125_v11  ;;  %v116_v20 = vsel %vm114_vm0, %v98_v12, 0  ;;  %v119_v36 = vsel %vm114_vm0, %v99_v26, 0 }
  0x1d   :  { %2726 = vmatpush.msra.mxu2 %v3038_v4  ;;  %v194_v22 = vand.u32 4294901760, %v193_v14  ;;  %v3075_v23 = vsub.f32 %v122_v10, %v3060_v15  ;;  %v200_v24 = vand.u32 4294901760, %v199_v16  ;;  %v206_v25 = vand.u32 4294901760, %v205_v17  ;;  %142 = vmatpush.msra.mxu0 %v3038_v4 }
  0x1e   :  { %v212_v27 = vand.u32 4294901760, %v3066_v18  ;;  %v3083_v28 = vsub.f32 %v125_v11, %v3068_v19  ;;  %v3085_v29 = vand.u32 4294901760, %v116_v20  ;;  %v3109_v43 = vand.u32 4294901760, %v119_v36 }
  0x1f   :  { %2727 = vmatpush.msra.mxu2 %v3040_v5  ;;  %v195_v30 = vsub.f32 %v193_v14, %v194_v22  ;;  %v3089_v31 = vand.u32 4294901760, %v3075_v23  ;;  %v201_v32 = vsub.f32 %v199_v16, %v200_v24  ;;  %v207_v33 = vsub.f32 %v205_v17, %v206_v25  ;;  %144 = vmatpush.msra.mxu0 %v3040_v5 }
  0x20   :  { %v213_v34 = vsub.f32 %v3066_v18, %v212_v27  ;;  %v3096_v35 = vsub.f32 %v116_v20, %v3085_v29  ;;  %v3103_v41 = vand.u32 4294901760, %v3083_v28  ;;  %v3121_v49 = vsub.f32 %v119_v36, %v3109_v43  ;;  %v854_v20 = vld [vmem:[%s3890_s29] sm:$0xf] }
  0x21   :  { %2728 = vmatpush.msra.mxu2 %v3051_v9  ;;  %v196_v38 = vand.u32 4294901760, %v195_v30  ;;  %v166_v39 = vsub.f32 %v3075_v23, %v3089_v31  ;;  %v202_v40 = vand.u32 4294901760, %v201_v32  ;;  %146 = vmatpush.msra.mxu0 %v3051_v9  ;;  %v208_v45 = vand.u32 4294901760, %v207_v33 }
  0x22   :  { %v3107_v42 = vand.u32 4294901760, %v3096_v35  ;;  %v214_v50 = vand.u32 4294901760, %v213_v34  ;;  %v174_v51 = vsub.f32 %v3083_v28, %v3103_v41  ;;  %v3132_v55 = vand.u32 4294901760, %v3121_v49 }
  0x23   :  { %247 = vmatpush.msrb.mxu2 %v193_v14  ;;  %338 = vmatpush.msrb.mxu0 %v194_v22  ;;  %v3111_v44 = vand.u32 4294901760, %v166_v39  ;;  %v524_v0 = vand.u32 4294901760, %v523_v61  ;;  %v519_v1 = vsub.f32 %v3127_v52, %v518_v60  ;;  %v463_v6 = vand.u32 4294901760, %v437_v2  ;;  %v103_v14 = vld [vmem:[%s3889_s1 + $0x8] sm:$0xff] }
  0x24   :  { %2729 = vmatpush.msra.mxu3 %v196_v38  ;;  %197 = vmatpush.msra.mxu1 %v196_v38  ;;  %v150_v48 = vsub.f32 %v3096_v35, %v3107_v42  ;;  %v158_v58 = vsub.f32 %v3121_v49, %v3132_v55  ;;  %v3140_v59 = vand.u32 4294901760, %v174_v51  ;;  %v514_v7 = vand.u32 4294901760, %v513_v62 }
  0x25   :  { %250 = vmatpush.msrb.mxu2 %v199_v16  ;;  %342 = vmatpush.msrb.mxu0 %v200_v24  ;;  %v520_v8 = vand.u32 4294901760, %v519_v1  ;;  %v104_v16 = vld [vmem:[%s3889_s1 + $0x10] sm:$0xff] }
  0x26   :  { %168 = vmatmul.f32.vlgmr.msra.gmra.mxu2 %v3111_v44  ;;  %2730 = vmatpush.msra.mxu3 %v202_v40  ;;  %v3129_v54 = vand.u32 4294901760, %v150_v48  ;;  %v3150_v63 = vand.u32 4294901760, %v158_v58 }
  0x27   :  { %203 = vmatpush.msra.mxu1 %v202_v40  ;;  %253 = vmatpush.msrb.mxu2 %v205_v17  ;;  %v105_v17 = vld [vmem:[%s3889_s1 + $0x18] sm:$0xff] }
  0x28   :  { %2731 = vmatpush.msra.mxu3 %v208_v45  ;;  %346 = vmatpush.msrb.mxu0 %v206_v25 }
  0x29   :  { %209 = vmatpush.msra.mxu1 %v208_v45  ;;  %152 = vmatmul.f32.vlgmr.msra.gmra.mxu0 %v3129_v54 }
  0x2a   :  { %2732 = vmatpush.msra.mxu3 %v214_v50  ;;  %256 = vmatpush.msrb.mxu2 %v3066_v18 }
  0x2b   :  { %225 = vmatmul.f32.vlgmr.msra.gmra.mxu3 %v3060_v15  ;;  %215 = vmatpush.msra.mxu1 %v214_v50 }
  0x2c   :  { %291 = vmatpush.msrb.mxu3 %v3036_v3  ;;  %217 = vmatmul.f32.vlgmr.msra.gmra.mxu1 %v3085_v29 }
  0x2d   :  { %458 = vmatpush.msra.mxu2 %v3071_v21  ;;  %381 = vmatpush.msrb.mxu1 %v3036_v3  ;;  %v525_v3 = vsub.f32 %v523_v61, %v524_v0 }
  0x2e   :  { %176 = vmatmul.f32.gmra.mxu2 %v3140_v59  ;;  %293 = vmatpush.msrb.mxu3 %v3038_v4 }
  0x2f   :  { %383 = vmatpush.msrb.mxu1 %v3038_v4  ;;  %460 = vmatpush.msra.mxu2 %v3116_v47  ;;  %v529_v4 = vsub.f32 %v437_v2, %v463_v6  ;;  %v526_v10 = vand.u32 4294901760, %v525_v3 }
  0x30   :  { %295 = vmatpush.msrb.mxu3 %v3040_v5  ;;  %350 = vmatpush.msrb.mxu0 %v212_v27 }
  0x31   :  { %160 = vmatmul.f32.gmra.mxu0 %v3150_v63  ;;  %385 = vmatpush.msrb.mxu1 %v3040_v5  ;;  %v530_v11 = vand.u32 4294901760, %v529_v4  ;;  %v102_v5 = vld [vmem:[%s3889_s1] sm:$0xff] }
  0x32   :  { %297 = vmatpush.msrb.mxu3 %v3051_v9  ;;  %462 = vmatpush.msra.mxu2 %v3134_v56 }
  0x33   :  { %229 = vmatmul.f32.gmra.mxu3 %v3068_v19  ;;  %387 = vmatpush.msrb.mxu1 %v3051_v9  ;;  %v531_v12 = vsub.f32 %v529_v4, %v530_v11 }
  0x34   :  { %515 = vmatpush.msra.mxu3 %v514_v7  ;;  %221 = vmatmul.f32.gmra.mxu1 %v3109_v43 }
  0x35   :  { %464 = vmatpush.msra.mxu2 %v463_v6  ;;  %565 = vmatpush.msra.mxu0 %v3114_v46  ;;  %v532_v9 = vand.u32 4294901760, %v531_v12 }
  0x36   :  { %259 = vmatmul.f32.vlgmr.msrb.gmra.mxu2 %v3096_v35  ;;  %521 = vmatpush.msra.mxu3 %v520_v8 }
  0x37   :  { %656 = vmatpush.msrb.mxu2 %v512_v57  ;;  %415 = vperm.xlu0 %2745, %v102_v5  }
  0x38   :  { %527 = vmatpush.msra.mxu3 %v526_v10  ;;  %609 = vmatpush.msra.mxu1 %v3071_v21 }
  0x39   :  { %352 = vmatmul.f32.vlgmr.msrb.gmra.mxu0 %v3085_v29  ;;  %660 = vmatpush.msrb.mxu2 %v518_v60 }
  0x3a   :  { %568 = vmatpush.msra.mxu0 %v3127_v52  ;;  %611 = vmatpush.msra.mxu1 %v3116_v47 }
  0x3b   :  { %301 = vmatmul.f32.vlgmr.msrb.gmra.mxu3 %v3107_v42  ;;  %664 = vmatpush.msrb.mxu2 %v524_v0 }
  0x3c   :  { %389 = vmatmul.f32.vlgmr.msrb.gmra.mxu1 %v3085_v29  ;;  %533 = vmatpush.msra.mxu3 %v532_v9 }
  0x3d   :  { %571 = vmatpush.msra.mxu0 %v523_v61  ;;  %613 = vmatpush.msra.mxu1 %v3134_v56 }
  0x3e   :  { %699 = vmatpush.msrb.mxu3 %v3071_v21  ;;  %264 = vmatmul.f32.gmra.mxu2 %v3121_v49  ;;  %v870_v21 = vsel %vm868_vm1, %v854_v20, 0 }
  0x3f   :  { %574 = vmatpush.msra.mxu0 %v529_v4  ;;  %420 = vperm.xlu0 %2745, %v103_v14   ;;  %v887_v24 = vand.u32 4294901760, %v870_v21 }
  0x40   :  { %701 = vmatpush.msrb.mxu3 %v3116_v47  ;;  %615 = vmatpush.msra.mxu1 %v463_v6 }
  0x41   :  { %356 = vmatmul.f32.gmra.mxu0 %v3109_v43  ;;  %668 = vmatpush.msrb.mxu2 %v530_v11  ;;  %v938_v25 = vsub.f32 %v870_v21, %v887_v24 }
  0x42   :  { %703 = vmatpush.msrb.mxu3 %v3134_v56  ;;  %425 = vperm.xlu1 %2746, %v104_v16  }
  0x43   :  { %307 = vmatmul.f32.gmra.mxu3 %v3132_v55  ;;  %888 = vmatpush.msrb.mxu0 %v887_v24  ;;  %v939_v26 = vand.u32 4294901760, %v938_v25 }
  0x44   :  { %393 = vmatmul.f32.gmra.mxu1 %v3109_v43  ;;  %705 = vmatpush.msrb.mxu3 %v463_v6 }
  0x46   :  { %269 = vmatmul.f32.gmra.mxu2 %v3075_v23 }
  0x49   :  { %360 = vmatmul.f32.gmra.mxu0 %v3060_v15 }
  0x4a   :  { %430 = vperm.xlu1 %2746, %v105_v17  }
  0x4b   :  { %313 = vmatmul.f32.gmra.mxu3 %v3089_v31 }
  0x4c   :  { %397 = vmatmul.f32.gmra.mxu1 %v3060_v15 }
  0x4e   :  { %274 = vmatmul.f32.gmra.mxu2 %v3083_v28 }
  0x51   :  { %364 = vmatmul.f32.gmra.mxu0 %v3068_v19 }
  0x53   :  { %319 = vmatmul.f32.gmra.mxu3 %v3103_v41 }
  0x54   :  { %401 = vmatmul.f32.gmra.mxu1 %v3068_v19 }
  0x56   :  { %470 = vmatmul.f32.vlgmr.msra.gmra.mxu2 %v3129_v54 }
  0x57   :  { %977 = vmatpush.msra.mxu2 %v938_v25 }
  0x59   :  { %577 = vmatmul.f32.vlgmr.msra.gmra.mxu0 %v3096_v35 }
  0x5a   :  { %1059 = vmatpush.msra.mxu0 %v939_v26 }
  0x5b   :  { %535 = vmatmul.f32.vlgmr.msra.gmra.mxu3 %v3085_v29 }
  0x5c   :  { %619 = vmatmul.f32.vlgmr.msra.gmra.mxu1 %v3107_v42  ;;  %1015 = vmatpush.msra.mxu3 %v887_v24 }
  0x5e   :  { %478 = vmatmul.f32.gmra.mxu2 %v3150_v63 }
  0x61   :  { %582 = vmatmul.f32.gmra.mxu0 %v3121_v49 }
  0x63   :  { %539 = vmatmul.f32.gmra.mxu3 %v3109_v43 }
  0x64   :  { %625 = vmatmul.f32.gmra.mxu1 %v3132_v55 }
  0x66   :  { %486 = vmatmul.f32.gmra.mxu2 %v3111_v44 }
  0x69   :  { %587 = vmatmul.f32.gmra.mxu0 %v3075_v23 }
  0x6b   :  { %543 = vmatmul.f32.gmra.mxu3 %v3060_v15 }
  0x6c   :  { %631 = vmatmul.f32.gmra.mxu1 %v3089_v31 }
  0x6e   :  { %494 = vmatmul.f32.gmra.mxu2 %v3140_v59 }
  0x71   :  { %592 = vmatmul.f32.gmra.mxu0 %v3083_v28  ;;  %v940_v28 = vsub.f32 %v938_v25, %v939_v26 }
  0x73   :  { %547 = vmatmul.f32.gmra.mxu3 %v3068_v19  ;;  %v941_v31 = vand.u32 4294901760, %v940_v28 }
  0x74   :  { %637 = vmatmul.f32.gmra.mxu1 %v3103_v41 }
  0x75   :  { %942 = vmatpush.msrb.mxu1 %v941_v31 }
  0x76   :  { %670 = vmatmul.f32.vlgmr.msrb.gmra.mxu2 %v3085_v29 }
  0x77   :  { %1093 = vmatpush.msra.mxu1 %v887_v24 }
  0x7b   :  { %707 = vmatmul.f32.vlgmr.msrb.gmra.mxu3 %v3085_v29 }
  0x7e   :  { %674 = vmatmul.f32.gmra.mxu2 %v3109_v43 }
  0x83   :  { %711 = vmatmul.f32.gmra.mxu3 %v3109_v43 }
  0x86   :  { %678 = vmatmul.f32.gmra.mxu2 %v3060_v15 }
  0x8b   :  { %715 = vmatmul.f32.gmra.mxu3 %v3060_v15 }
  0x8e   :  { %682 = vmatmul.f32.gmra.mxu2 %v3068_v19 }
  0x93   :  { %719 = vmatmul.f32.gmra.mxu3 %v3068_v19  ;;  %v2747_v19 = vld [vmem:[%s3857_s5] ss:$0 sm:$0xff]  ;;  %s3893_s5 = sld [smem:[#allocation14_spill]] }
  0xa6   :  { %v153_v18 = vpop.f32.mrf.mxu0 }
  0xa7   :  { %v154_v32 = vadd.f32 %v2747_v19, %v153_v18 }
  0xa9   :  { %v169_v22 = vpop.f32.mrf.mxu2  ;;  %v218_v23 = vpop.f32.mrf.mxu1 }
  0xaa   :  { %v219_v34 = vadd.f32 %v218_v23, %v154_v32  ;;  %v170_v51 = vadd.f32 %v2747_v19, %v169_v22  ;;  %v416_v55 = vpop.permute.xlu0 %415 }
  0xae   :  { %v226_v15 = vpop.f32.mrf.mxu3  ;;  %v161_v27 = vpop.f32.mrf.mxu0 }
  0xaf   :  { %v162_v38 = vadd.f32 %v2747_v19, %v161_v27  ;;  %v227_v56 = vadd.f32 %v226_v15, %v170_v51 }
  0xb1   :  { %v177_v29 = vpop.f32.mrf.mxu2  ;;  %v222_v30 = vpop.f32.mrf.mxu1 }
  0xb2   :  { %v223_v41 = vadd.f32 %v222_v30, %v162_v38  ;;  %v178_v1 = vadd.f32 %v2747_v19, %v177_v29  ;;  %v421_v5 = vpop.permute.xlu0 %420 }
  0xb4   :  { %v426_v27 = vpop.permute.xlu1 %425 }
  0xb6   :  { %v230_v33 = vpop.f32.mrf.mxu3  ;;  %v353_v35 = vpop.f32.mrf.mxu0 }
  0xb7   :  { %v231_v4 = vadd.f32 %v230_v33, %v178_v1 }
  0xb9   :  { %v260_v36 = vpop.f32.mrf.mxu2  ;;  %v390_v37 = vpop.f32.mrf.mxu1 }
  0xba   :  { %v261_v39 = vadd.f32 %v260_v36, %v219_v34 }
  0xbe   :  { %v302_v40 = vpop.f32.mrf.mxu3  ;;  %v357_v45 = vpop.f32.mrf.mxu0 }
  0xbf   :  { %v303_v42 = vadd.f32 %v302_v40, %v261_v39  ;;  %v431_v40 = vpop.permute.xlu1 %430 }
  0xc1   :  { %v265_v43 = vpop.f32.mrf.mxu2  ;;  %v354_v44 = vadd.f32 %v353_v35, %v303_v42  ;;  %v394_v48 = vpop.f32.mrf.mxu1 }
  0xc2   :  { %v266_v46 = vadd.f32 %v265_v43, %v223_v41 }
  0xc3   :  { %v391_v47 = vadd.f32 %v390_v37, %v354_v44 }
  0xc5   :  { %v405_v49 = vmul.f32 1.442695, %v391_v47 }
  0xc6   :  { %v308_v50 = vpop.f32.mrf.mxu3  ;;  %v361_v58 = vpop.f32.mrf.mxu0 }
  0xc7   :  { %2758 = vpow2.f32 %v405_v49  ;;  %v309_v52 = vadd.f32 %v308_v50, %v266_v46  ;;  %v2748_v50 = vld [vmem:[%s3859_s7] ss:$0 sm:$0xff] }
  0xc9   :  { %v270_v53 = vpop.f32.mrf.mxu2  ;;  %v358_v54 = vadd.f32 %v357_v45, %v309_v52  ;;  %v398_v0 = vpop.f32.mrf.mxu1 }
  0xca   :  { %v271_v60 = vadd.f32 %v270_v53, %v227_v56 }
  0xcb   :  { %v395_v57 = vadd.f32 %v394_v48, %v358_v54 }
  0xcd   :  { %v2759_v59 = vpop.eup %2758  ;;  %v407_v61 = vmul.f32 1.442695, %v395_v57 }
  0xce   :  { %v433_v62 = vmul.f32 %v2759_v59, %v416_v55  ;;  %v314_v63 = vpop.f32.mrf.mxu3  ;;  %v365_v18 = vpop.f32.mrf.mxu0 }
  0xcf   :  { %2760 = vpow2.f32 %v407_v61  ;;  %v315_v2 = vadd.f32 %v314_v63, %v271_v60 }
  0xd0   :  { %v857_v6 = vsel %vm855_vm2, %v433_v62, 0 }
  0xd1   :  { %v3236_v7 = vand.u32 4294901760, %v857_v6  ;;  %v275_v3 = vpop.f32.mrf.mxu2  ;;  %v362_v8 = vadd.f32 %v361_v58, %v315_v2  ;;  %v402_v23 = vpop.f32.mrf.mxu1 }
  0xd2   :  { %v276_v13 = vadd.f32 %v275_v3, %v231_v4 }
  0xd3   :  { %v890_v10 = vsub.f32 %v857_v6, %v3236_v7  ;;  %v399_v11 = vadd.f32 %v398_v0, %v362_v8  ;;  %944 = vmatmul.f32.vlgmr.msrb.gmra.mxu1 %v3236_v7 }
  0xd5   :  { %v2761_v12 = vpop.eup %2760  ;;  %v409_v9 = vmul.f32 1.442695, %v399_v11  ;;  %980 = vmatmul.f32.vlgmr.msra.gmra.mxu2 %v890_v10  ;;  %v891_v14 = vand.u32 4294901760, %v890_v10 }
  0xd6   :  { %v434_v16 = vmul.f32 %v2761_v12, %v421_v5  ;;  %v320_v17 = vpop.f32.mrf.mxu3  ;;  %v578_v53 = vpop.f32.mrf.mxu0 }
  0xd7   :  { %2762 = vpow2.f32 %v409_v9  ;;  %v321_v20 = vadd.f32 %v320_v17, %v276_v13  ;;  %1019 = vmatmul.f32.vlgmr.msra.gmra.mxu3 %v891_v14  ;;  %v892_v21 = vsub.f32 %v890_v10, %v891_v14 }
  0xd8   :  { %v860_v22 = vsel %vm855_vm2, %v434_v16, 0 }
  0xd9   :  { %v3241_v24 = vand.u32 4294901760, %v860_v22  ;;  %v366_v25 = vadd.f32 %v365_v18, %v321_v20  ;;  %v471_v26 = vpop.f32.mrf.mxu2  ;;  %v893_v15 = vand.u32 4294901760, %v892_v21  ;;  %v620_v59 = vpop.f32.mrf.mxu1 }
  0xda   :  { %v472_v55 = vadd.f32 %v2748_v50, %v471_v26 }
  0xdb   :  { %v898_v28 = vsub.f32 %v860_v22, %v3241_v24  ;;  %v403_v19 = vadd.f32 %v402_v23, %v366_v25  ;;  %894 = vmatmul.f32.vlgmr.msrb.gmra.mxu0 %v893_v15  ;;  %948 = vmatmul.f32.gmra.mxu1 %v3241_v24 }
  0xdd   :  { %v2763_v29 = vpop.eup %2762  ;;  %v411_v30 = vmul.f32 1.442695, %v403_v19  ;;  %985 = vmatmul.f32.gmra.mxu2 %v898_v28  ;;  %v899_v31 = vand.u32 4294901760, %v898_v28 }
  0xde   :  { %v435_v32 = vmul.f32 %v2763_v29, %v426_v27  ;;  %v536_v33 = vpop.f32.mrf.mxu3  ;;  %v583_v0 = vpop.f32.mrf.mxu0 }
  0xdf   :  { %2764 = vpow2.f32 %v411_v30  ;;  %1025 = vmatmul.f32.gmra.mxu3 %v899_v31  ;;  %v900_v34 = vsub.f32 %v898_v28, %v899_v31  ;;  %v537_v60 = vadd.f32 %v536_v33, %v472_v55 }
  0xe0   :  { %v863_v35 = vsel %vm855_vm2, %v435_v32, 0 }
  0xe1   :  { %v3246_v36 = vand.u32 4294901760, %v863_v35  ;;  %v479_v37 = vpop.f32.mrf.mxu2  ;;  %v901_v38 = vand.u32 4294901760, %v900_v34  ;;  %v579_v63 = vadd.f32 %v578_v53, %v537_v60  ;;  %v626_v3 = vpop.f32.mrf.mxu1 }
  0xe2   :  { %v480_v62 = vadd.f32 %v2748_v50, %v479_v37 }
  0xe3   :  { %v906_v39 = vsub.f32 %v863_v35, %v3246_v36  ;;  %902 = vmatmul.f32.gmra.mxu0 %v901_v38  ;;  %952 = vmatmul.f32.gmra.mxu1 %v3246_v36  ;;  %v621_v2 = vadd.f32 %v620_v59, %v579_v63  ;;  %v2903_v38 = vmov 32.0  }
  0xe4   :  { %2766 = vrcp.f32 %v2903_v38 }
  0xe5   :  { %v2765_v41 = vpop.eup %2764  ;;  %990 = vmatmul.f32.gmra.mxu2 %v906_v39  ;;  %v907_v42 = vand.u32 4294901760, %v906_v39 }
  0xe6   :  { %v436_v43 = vmul.f32 %v2765_v41, %v431_v40  ;;  %v540_v44 = vpop.f32.mrf.mxu3  ;;  %v588_v9 = vpop.f32.mrf.mxu0 }
  0xe7   :  { %1031 = vmatmul.f32.gmra.mxu3 %v907_v42  ;;  %v908_v45 = vsub.f32 %v906_v39, %v907_v42  ;;  %v541_v6 = vadd.f32 %v540_v44, %v480_v62 }
  0xe8   :  { %v866_v46 = vsel %vm855_vm2, %v436_v43, 0 }
  0xe9   :  { %v3251_v47 = vand.u32 4294901760, %v866_v46  ;;  %v487_v48 = vpop.f32.mrf.mxu2  ;;  %v909_v49 = vand.u32 4294901760, %v908_v45  ;;  %v584_v11 = vadd.f32 %v583_v0, %v541_v6  ;;  %v632_v17 = vpop.f32.mrf.mxu1 }
  0xea   :  { %v488_v10 = vadd.f32 %v2748_v50, %v487_v48  ;;  %v2767_v39 = vpop.eup %2766 }
  0xeb   :  { %v914_v51 = vsub.f32 %v866_v46, %v3251_v47  ;;  %910 = vmatmul.f32.gmra.mxu0 %v909_v49  ;;  %956 = vmatmul.f32.gmra.mxu1 %v3251_v47  ;;  %v627_v14 = vadd.f32 %v626_v3, %v584_v11  ;;  %v738_v40 = vmul.f32 32.0, %v2767_v39  ;;  %vm742_vm3 = vweird.f32 %v2767_v39 }
  0xed   :  { %995 = vmatmul.f32.gmra.mxu2 %v914_v51  ;;  %v915_v52 = vand.u32 4294901760, %v914_v51  ;;  %v739_v41 = vsub.f32 1.0, %v738_v40 }
  0xee   :  { %v544_v54 = vpop.f32.mrf.mxu3  ;;  %v593_v27 = vpop.f32.mrf.mxu0 }
  0xef   :  { %1037 = vmatmul.f32.gmra.mxu3 %v915_v52  ;;  %v916_v56 = vsub.f32 %v914_v51, %v915_v52  ;;  %v545_v16 = vadd.f32 %v544_v54, %v488_v10  ;;  %v740_v42 = vmul.f32 %v2767_v39, %v739_v41 }
  0xf1   :  { %v495_v57 = vpop.f32.mrf.mxu2  ;;  %v917_v58 = vand.u32 4294901760, %v916_v56  ;;  %v589_v21 = vadd.f32 %v588_v9, %v545_v16  ;;  %v638_v30 = vpop.f32.mrf.mxu1  ;;  %v741_v43 = vadd.f32 %v2767_v39, %v740_v42 }
  0xf2   :  { %v496_v20 = vadd.f32 %v2748_v50, %v495_v57 }
  0xf3   :  { %918 = vmatmul.f32.gmra.mxu0 %v917_v58  ;;  %1095 = vmatmul.f32.vlgmr.msra.gmra.mxu1 %v3236_v7  ;;  %v633_v26 = vadd.f32 %v632_v17, %v589_v21  ;;  %v3270_v44 = vsel %vm742_vm3, %v2767_v39, %v741_v43 }
  0xf6   :  { %v548_v61 = vpop.f32.mrf.mxu3 }
  0xf7   :  { %v549_v15 = vadd.f32 %v548_v61, %v496_v20 }
  0xf9   :  { %v671_v1 = vpop.f32.mrf.mxu2  ;;  %v594_v19 = vadd.f32 %v593_v27, %v549_v15 }
  0xfa   :  { %v672_v8 = vadd.f32 %v671_v1, %v621_v2 }
  0xfb   :  { %1061 = vmatmul.f32.vlgmr.msra.gmra.mxu0 %v3236_v7  ;;  %1099 = vmatmul.f32.gmra.mxu1 %v3241_v24  ;;  %v639_v33 = vadd.f32 %v638_v30, %v594_v19 }
  0xfe   :  { %v708_v4 = vpop.f32.mrf.mxu3 }
  0xff   :  { %v709_v5 = vadd.f32 %v708_v4, %v672_v8 }
 0x101   :  { %v675_v12 = vpop.f32.mrf.mxu2  ;;  %v725_v13 = vsel %vm114_vm0, %v709_v5, 0.0 }
 0x102   :  { %726 = vadd.xlane.f32.xlu2 %v725_v13  ;;  %v676_v7 = vadd.f32 %v675_v12, %v627_v14 }
 0x103   :  { %1065 = vmatmul.f32.gmra.mxu0 %v3241_v24  ;;  %1103 = vmatmul.f32.gmra.mxu1 %v3246_v36 }
 0x106   :  { %v712_v18 = vpop.f32.mrf.mxu3 }
 0x107   :  { %v713_v22 = vadd.f32 %v712_v18, %v676_v7 }
 0x109   :  { %v679_v23 = vpop.f32.mrf.mxu2  ;;  %v728_v25 = vsel %vm114_vm0, %v713_v22, 0.0 }
 0x10a   :  { %729 = vadd.xlane.f32.xlu2 %v728_v25  ;;  %v680_v24 = vadd.f32 %v679_v23, %v633_v26 }
 0x10b   :  { %1069 = vmatmul.f32.gmra.mxu0 %v3246_v36  ;;  %1107 = vmatmul.f32.gmra.mxu1 %v3251_v47 }
 0x10e   :  { %v716_v28 = vpop.f32.mrf.mxu3 }
 0x10f   :  { %v717_v29 = vadd.f32 %v716_v28, %v680_v24 }
 0x111   :  { %v731_v31 = vsel %vm114_vm0, %v717_v29, 0.0  ;;  %v683_v32 = vpop.f32.mrf.mxu2 }
 0x112   :  { %732 = vadd.xlane.f32.xlu0 %v731_v31  ;;  %v684_v34 = vadd.f32 %v683_v32, %v639_v33 }
 0x113   :  { %1073 = vmatmul.f32.gmra.mxu0 %v3251_v47 }
 0x116   :  { %v720_v35 = vpop.f32.mrf.mxu3 }
 0x117   :  { %v721_v37 = vadd.f32 %v720_v35, %v684_v34 }
 0x119   :  { %v734_v36 = vsel %vm114_vm0, %v721_v37, 0.0 }
 0x11a   :  { %735 = vadd.xlane.f32.xlu1 %v734_v36 }
 0x150   :  { %v945_v2 = vpop.f32.mrf.mxu1 }
 0x158   :  { %v895_v1 = vpop.f32.mrf.mxu0  ;;  %v949_v3 = vpop.f32.mrf.mxu1 }
 0x159   :  { %v981_v11 = vpop.f32.mrf.mxu2  ;;  %v946_v23 = vadd.f32 %v945_v2, %v895_v1 }
 0x15a   :  { %v1020_v12 = vpop.f32.mrf.mxu3 }
 0x160   :  { %v903_v6 = vpop.f32.mrf.mxu0  ;;  %v953_v4 = vpop.f32.mrf.mxu1 }
 0x161   :  { %v986_v9 = vpop.f32.mrf.mxu2 }
 0x162   :  { %v1026_v16 = vpop.f32.mrf.mxu3 }
 0x168   :  { %v911_v8 = vpop.f32.mrf.mxu0 }
 0x169   :  { %v991_v17 = vpop.f32.mrf.mxu2  ;;  %v954_v27 = vadd.f32 %v953_v4, %v911_v8 }
 0x16a   :  { %v1032_v20 = vpop.f32.mrf.mxu3 }
 0x16b   :  { %v992_v33 = vadd.f32 %v991_v17, %v954_v27 }
 0x16d   :  { %v1033_v40 = vadd.f32 %v1032_v20, %v992_v33 }
 0x170   :  { %v919_v10 = vpop.f32.mrf.mxu0 }
 0x171   :  { %v996_v28 = vpop.f32.mrf.mxu2 }
 0x172   :  { %v1038_v34 = vpop.f32.mrf.mxu3 }
 0x175   :  { %v727_v45 = vpop.xlane.xlu2 %726 }
 0x176   :  { %v744_v46 = vmul.f32 %v3270_v44, %v727_v45 }
 0x178   :  { %v3273_v47 = vsub.f32 %v709_v5, %v744_v46  ;;  %v957_v5 = vpop.f32.mrf.mxu1  ;;  %v1062_v13 = vpop.f32.mrf.mxu0 }
 0x179   :  { %v958_v25 = vadd.f32 %v957_v5, %v919_v10  ;;  %v3318_v5 = vld [vmem:[%s3860_s8] ss:$0 sm:$0xff] }
 0x17a   :  { %v752_v48 = vmul.f32 %v3273_v47, %v3273_v47 }
 0x17b   :  { %v997_v30 = vadd.f32 %v996_v28, %v958_v25 }
 0x17c   :  { %v756_v49 = vsel %vm114_vm0, %v752_v48, 0.0 }
 0x17d   :  { %757 = vadd.xlane.f32.xlu2 %v756_v49  ;;  %v730_v50 = vpop.xlane.xlu2 %729  ;;  %v1039_v36 = vadd.f32 %v1038_v34, %v997_v30  ;;  %v1188_v34 = vld [vmem:[%s3862_s10 + $0x18] sm:$0xff] }
 0x17e   :  { %v745_v51 = vmul.f32 %v3270_v44, %v730_v50 }
 0x180   :  { %v3279_v52 = vsub.f32 %v713_v22, %v745_v51  ;;  %v1096_v14 = vpop.f32.mrf.mxu1  ;;  %v1066_v7 = vpop.f32.mrf.mxu0  ;;  %v950_v22 = vadd.f32 %v949_v3, %v903_v6 }
 0x182   :  { %v753_v53 = vmul.f32 %v3279_v52, %v3279_v52  ;;  %v987_v15 = vadd.f32 %v986_v9, %v950_v22 }
 0x184   :  { %v759_v54 = vsel %vm114_vm0, %v753_v53, 0.0  ;;  %v1027_v32 = vadd.f32 %v1026_v16, %v987_v15 }
 0x185   :  { %v733_v55 = vpop.xlane.xlu0 %732  ;;  %760 = vadd.xlane.f32.xlu2 %v759_v54 }
 0x186   :  { %v746_v56 = vmul.f32 %v3270_v44, %v733_v55  ;;  %v1067_v38 = vadd.f32 %v1066_v7, %v1027_v32 }
 0x188   :  { %v3285_v57 = vsub.f32 %v717_v29, %v746_v56  ;;  %v1100_v18 = vpop.f32.mrf.mxu1  ;;  %v1070_v21 = vpop.f32.mrf.mxu0  ;;  %v982_v29 = vadd.f32 %v981_v11, %v946_v23 }
 0x189   :  { %v3298_v46 = vadd.f32 %v1100_v18, %v1067_v38  ;;  %v1071_v48 = vadd.f32 %v1070_v21, %v1033_v40  ;;  %v3346_v38 = vand.u32 4294901760, %v1188_v34  ;;  %v1185_v40 = vld [vmem:[%s3862_s10] sm:$0xff] }
 0x18a   :  { %v754_v58 = vmul.f32 %v3285_v57, %v3285_v57 }
 0x18b   :  { %v1112_v56 = vsel %vm114_vm0, %v3298_v46, 0.0  ;;  %1212 = vmatpush.msrb.mxu2 %v3346_v38 }
 0x18c   :  { %v762_v59 = vsel %vm114_vm0, %v754_v58, 0.0 }
 0x18d   :  { %v736_v60 = vpop.xlane.xlu1 %735  ;;  %763 = vadd.xlane.f32.xlu2 %v762_v59 }
 0x18e   :  { %v747_v61 = vmul.f32 %v3270_v44, %v736_v60 }
 0x190   :  { %v3291_v62 = vsub.f32 %v721_v37, %v747_v61  ;;  %v1104_v19 = vpop.f32.mrf.mxu1  ;;  %v1074_v35 = vpop.f32.mrf.mxu0  ;;  %v1021_v37 = vadd.f32 %v1020_v12, %v982_v29 }
 0x191   :  { %v1075_v42 = vadd.f32 %v1074_v35, %v1039_v36  ;;  %v3306_v58 = vadd.f32 %v1104_v19, %v1071_v48  ;;  %v1187_v35 = vld [vmem:[%s3862_s10 + $0x10] sm:$0xff] }
 0x192   :  { %v755_v63 = vmul.f32 %v3291_v62, %v3291_v62  ;;  %v1063_v41 = vadd.f32 %v1062_v13, %v1021_v37  ;;  %v1186_v37 = vld [vmem:[%s3862_s10 + $0x8] sm:$0xff]  ;;  %s2907_s10 = smov 96  }
 0x193   :  { %v1120_v3 = vsel %vm114_vm0, %v3306_v58, 0.0 }
 0x194   :  { %v765_v0 = vsel %vm114_vm0, %v755_v63, 0.0  ;;  %v3300_v53 = vadd.f32 %v1096_v14, %v1063_v41  ;;  %v3323_v14 = vld [vmem:[%s3861_s9] ss:$0 sm:$0xff] }
 0x195   :  { %766 = vadd.xlane.f32.xlu2 %v765_v0 }
 0x196   :  { %v1111_v61 = vsel %vm114_vm0, %v3300_v53, 0.0 }
 0x197   :  { %v1113_v1 = vadd.f32 %v1112_v56, %v1111_v61 }
 0x198   :  { %v1108_v50 = vpop.f32.mrf.mxu1 }
 0x199   :  { %v3302_v54 = vadd.f32 %v1108_v50, %v1075_v42  ;;  %v1114_v12 = vrot.slane %v1113_v1, 4 }
 0x19b   :  { %v1121_v63 = vsel %vm114_vm0, %v3302_v54, 0.0  ;;  %v1115_v22 = vadd.f32 %v1114_v12, %v1113_v1 }
 0x19c   :  { %v1122_v4 = vadd.f32 %v1121_v63, %v1120_v3 }
 0x19d   :  { %v1116_v19 = vrot.slane %v1115_v22, 2 }
 0x19e   :  { %v1123_v7 = vrot.slane %v1122_v4, 4 }
 0x19f   :  { %v1117_v41 = vadd.f32 %v1116_v19, %v1115_v22 }
 0x1a0   :  { %v1124_v27 = vadd.f32 %v1123_v7, %v1122_v4 }
 0x1a2   :  { %v1125_v32 = vrot.slane %v1124_v27, 2 }
 0x1f0   :  { %v758_v26 = vpop.xlane.xlu2 %757 }
 0x1f1   :  { %v768_v24 = vmul.f32 %v758_v26, %v3270_v44 }
 0x1f3   :  { %v772_v31 = vadd.f32 1e-05, %v768_v24 }
 0x1f5   :  { %2768 = vrsqrt.f32 %v772_v31  ;;  %vm782_vm5 = vweird.f32 %v772_v31 }
 0x1f8   :  { %v761_v39 = vpop.xlane.xlu2 %760 }
 0x1f9   :  { %v769_v43 = vmul.f32 %v761_v39, %v3270_v44  ;;  %v3350_v39 = vand.u32 4294901760, %v1186_v37 }
 0x1fb   :  { %v2769_v45 = vpop.eup %2768  ;;  %v773_v49 = vadd.f32 1e-05, %v769_v43  ;;  %v3355_v43 = vand.u32 4294901760, %v1185_v40 }
 0x1fc   :  { %v777_v51 = vmul.f32 %v2769_v45, %v772_v31  ;;  %vm783_vm4 = vweird.f32 %v2769_v45 }
 0x1fd   :  { %2770 = vrsqrt.f32 %v773_v49  ;;  %vm784_vm6 = vmor %vm782_vm5, %vm783_vm4  ;;  %vm792_vm8 = vweird.f32 %v773_v49 }
 0x1fe   :  { %v778_v55 = vmul.f32 %v2769_v45, %v777_v51  ;;  %v3366_v51 = vsub.f32 %v1186_v37, %v3350_v39 }
 0x200   :  { %v779_v59 = vmul.f32 0.5, %v778_v55  ;;  %v764_v60 = vpop.xlane.xlu2 %763  ;;  %v1254_v3 = vand.u32 4294901760, %v3366_v51 }
 0x201   :  { %v770_v0 = vmul.f32 %v764_v60, %v3270_v44  ;;  %v1126_v60 = vadd.f32 %v1125_v32, %v1124_v27 }
 0x202   :  { %v780_v2 = vsub.f32 1.5, %v779_v59  ;;  %v3370_v59 = vsub.f32 %v1185_v40, %v3355_v43  ;;  %v1255_v12 = vsub.f32 %v3366_v51, %v1254_v3 }
 0x203   :  { %v2771_v6 = vpop.eup %2770  ;;  %v774_v8 = vadd.f32 1e-05, %v770_v0 }
 0x204   :  { %v781_v10 = vmul.f32 %v2769_v45, %v780_v2  ;;  %v787_v11 = vmul.f32 %v2771_v6, %v773_v49  ;;  %vm793_vm7 = vweird.f32 %v2771_v6  ;;  %v3360_v49 = vsub.f32 %v1188_v34, %v3346_v38 }
 0x205   :  { %2772 = vrsqrt.f32 %v774_v8  ;;  %vm794_vm9 = vmor %vm792_vm8, %vm793_vm7  ;;  %vm802_vm11 = vweird.f32 %v774_v8 }
 0x206   :  { %v785_v13 = vsel %vm784_vm6, %v2769_v45, %v781_v10  ;;  %v788_v9 = vmul.f32 %v2771_v6, %v787_v11  ;;  %v1242_v63 = vand.u32 4294901760, %v3360_v49 }
 0x207   :  { %v816_v16 = vmul.f32 %v785_v13, %v3273_v47  ;;  %v1260_v13 = vand.u32 4294901760, %v3370_v59 }
 0x208   :  { %v789_v17 = vmul.f32 0.5, %v788_v9  ;;  %v767_v18 = vpop.xlane.xlu2 %766  ;;  %v1243_v4 = vsub.f32 %v3360_v49, %v1242_v63  ;;  %v1118_v9 = vrot.slane %v1117_v41, 1 }
 0x209   :  { %v823_v20 = vmul.f32 %v3318_v5, %v816_v16  ;;  %v771_v21 = vmul.f32 %v767_v18, %v3270_v44 }
 0x20a   :  { %v790_v23 = vsub.f32 1.5, %v789_v17  ;;  %v1244_v16 = vand.u32 4294901760, %v1243_v4  ;;  %v1127_v17 = vrot.slane %v1126_v60, 1  ;;  %v1119_v27 = vadd.f32 %v1118_v9, %v1117_v41 }
 0x20b   :  { %v2773_v25 = vpop.eup %2772  ;;  %v3329_v26 = vadd.f32 %v3323_v14, %v823_v20  ;;  %v3331_v15 = vadd.f32 1e-05, %v771_v21  ;;  %v1261_v21 = vsub.f32 %v3370_v59, %v1260_v13 }
 0x20c   :  { %v791_v24 = vmul.f32 %v2771_v6, %v790_v23  ;;  %v797_v47 = vmul.f32 %v2773_v25, %v774_v8  ;;  %vm803_vm10 = vweird.f32 %v2773_v25  ;;  %1245 = vmatpush.msrb.mxu3 %v1244_v16  ;;  %v1256_v23 = vand.u32 4294901760, %v1255_v12 }
 0x20d   :  { %v838_v28 = vmul.f32 1.442695, %v3329_v26  ;;  %2774 = vrsqrt.f32 %v3331_v15  ;;  %vm804_vm12 = vmor %vm802_vm11, %vm803_vm10  ;;  %vm812_vm14 = vweird.f32 %v3331_v15  ;;  %vm834_vm15 = vcmp.gt.f32.partialorder %v3329_v26, 0.0 }
 0x20e   :  { %v795_v29 = vsel %vm794_vm9, %v2771_v6, %v791_v24  ;;  %v798_v30 = vmul.f32 %v2773_v25, %v797_v47  ;;  %v1128_v19 = vadd.f32 %v1127_v17, %v1126_v60 }
 0x20f   :  { %v817_v31 = vmul.f32 %v795_v29, %v3279_v52  ;;  %2776 = vpow2.f32 %v838_v28  ;;  %v3348_v52 = vand.u32 4294901760, %v1187_v35  ;;  %v1262_v28 = vand.u32 4294901760, %v1261_v21 }
 0x210   :  { %v799_v33 = vmul.f32 0.5, %v798_v30 }
 0x211   :  { %v824_v36 = vmul.f32 %v3318_v5, %v817_v31  ;;  %v3363_v50 = vsub.f32 %v1187_v35, %v3348_v52  ;;  %1214 = vmatpush.msrb.mxu2 %v3348_v52 }
 0x212   :  { %v800_v42 = vsub.f32 1.5, %v799_v33  ;;  %v3405_v33 = vadd.f32 1e-05, %v1119_v27 }
 0x213   :  { %v2775_v45 = vpop.eup %2774  ;;  %v831_v48 = vadd.f32 %v3323_v14, %v824_v36  ;;  %v1248_v0 = vand.u32 4294901760, %v3363_v50  ;;  %1216 = vmatpush.msrb.mxu2 %v3350_v39 }
 0x214   :  { %v801_v55 = vmul.f32 %v2773_v25, %v800_v42  ;;  %v807_v56 = vmul.f32 %v2775_v45, %v3331_v15  ;;  %vm813_vm13 = vweird.f32 %v2775_v45  ;;  %vm1136_vm9 = vweird.f32 %v3405_v33 }
 0x215   :  { %v840_v61 = vmul.f32 1.442695, %v831_v48  ;;  %v2777_v1 = vpop.eup %2776  ;;  %v1249_v10 = vsub.f32 %v3363_v50, %v1248_v0  ;;  %1218 = vmatpush.msrb.mxu2 %v3355_v43  ;;  %vm814_vm3 = vmor %vm812_vm14, %vm813_vm13  ;;  %vm835_vm4 = vcmp.gt.f32.partialorder %v831_v48, 0.0 }
 0x216   :  { %v805_v2 = vsel %vm804_vm12, %v2773_v25, %v801_v55  ;;  %v808_v6 = vmul.f32 %v2775_v45, %v807_v56  ;;  %v2712_v18 = vadd.f32 -1.0, %v2777_v1 }
 0x217   :  { %2778 = vpow2.f32 %v840_v61  ;;  %v818_v8 = vmul.f32 %v805_v2, %v3285_v57  ;;  %v1250_v7 = vand.u32 4294901760, %v1249_v10  ;;  %1283 = vmatpush.msra.mxu2 %v3360_v49 }
 0x218   :  { %v809_v11 = vmul.f32 0.5, %v808_v6  ;;  %v3399_v29 = vsel %vm834_vm15, %v3329_v26, %v2712_v18  ;;  %v3409_v26 = vadd.f32 1e-05, %v1128_v19  ;;  %vm1195_vm15 = vcmask 1041409  }
 0x219   :  { %v825_v57 = vmul.f32 %v3318_v5, %v818_v8  ;;  %1286 = vmatpush.msra.mxu2 %v3363_v50  ;;  %1251 = vmatpush.msrb.mxu3 %v1250_v7  ;;  %v1161_v35 = vmul.f32 %v3300_v53, %v3399_v29 }
 0x21a   :  { %v810_v20 = vsub.f32 1.5, %v809_v11  ;;  %vm1151_vm11 = vweird.f32 %v3409_v26 }
 0x21b   :  { %v832_v22 = vadd.f32 %v3323_v14, %v825_v57  ;;  %1289 = vmatpush.msra.mxu2 %v3366_v51  ;;  %1257 = vmatpush.msrb.mxu3 %v1256_v23  ;;  %v1165_v41 = vsel %vm114_vm0, %v1161_v35, 0.0 }
 0x21c   :  { %v811_v25 = vmul.f32 %v2775_v45, %v810_v20 }
 0x21d   :  { %v2779_v24 = vpop.eup %2778  ;;  %v842_v47 = vmul.f32 1.442695, %v832_v22  ;;  %1292 = vmatpush.msra.mxu2 %v3370_v59  ;;  %1263 = vmatpush.msrb.mxu3 %v1262_v28  ;;  %vm836_vm5 = vcmp.gt.f32.partialorder %v832_v22, 0.0  ;;  %v1157_v28 = vand.u32 2147483648, %v3409_v26 }
 0x21e   :  { %v2713_v30 = vadd.f32 -1.0, %v2779_v24  ;;  %v815_v31 = vsel %vm814_vm3, %v2775_v45, %v811_v25  ;;  %vm1386_vm3 = vcmask 25600  }
 0x21f   :  { %2780 = vpow2.f32 %v842_v47  ;;  %v819_v15 = vmul.f32 %v815_v31, %v3291_v62  ;;  %1312 = vmatpush.msra.mxu3 %v3346_v38  ;;  %v1142_v47 = vand.u32 2147483648, %v3405_v33  ;;  %v1155_v31 = vand.u32 2147483647, %v3409_v26 }
 0x220   :  { %v3403_v32 = vsel %vm835_vm4, %v831_v48, %v2713_v30  ;;  %2782 = vrcp.f32 %v3405_v33  ;;  %v1140_v30 = vand.u32 2147483647, %v3405_v33 }
 0x221   :  { %v826_v34 = vmul.f32 %v3318_v5, %v819_v15  ;;  %v1162_v37 = vmul.f32 %v3298_v46, %v3403_v32  ;;  %1314 = vmatpush.msra.mxu3 %v3348_v52  ;;  %2784 = vrcp.f32 %v3409_v26  ;;  %vm1156_vm14 = vcmp.eq.f32.partialorder %v1155_v31, 8.507059e+37 }
 0x222   :  { %vm1141_vm13 = vcmp.eq.f32.partialorder %v1140_v30, 8.507059e+37 }
 0x223   :  { %v833_v62 = vadd.f32 %v3323_v14, %v826_v34  ;;  %v1166_v36 = vsel %vm114_vm0, %v1162_v37, 0.0  ;;  %1316 = vmatpush.msra.mxu3 %v3350_v39 }
 0x224   :  { %v1167_v42 = vadd.f32 %v1166_v36, %v1165_v41  ;;  %v1143_v36 = vor.u32 1.1754944e-38, %v1142_v47 }
 0x225   :  { %v2781_v5 = vpop.eup %2780  ;;  %v844_v40 = vmul.f32 1.442695, %v833_v62  ;;  %1318 = vmatpush.msra.mxu3 %v3355_v43  ;;  %vm837_vm6 = vcmp.gt.f32.partialorder %v833_v62, 0.0 }
 0x226   :  { %v2714_v45 = vadd.f32 -1.0, %v2781_v5  ;;  %v2783_v14 = vpop.eup %2782  ;;  %v1168_v48 = vrot.slane %v1167_v42, 4  ;;  %v1158_v5 = vor.u32 1.1754944e-38, %v1157_v28 }
 0x227   :  { %2786 = vpow2.f32 %v844_v40  ;;  %v2785_v55 = vpop.eup %2784  ;;  %v1132_v61 = vmul.f32 %v2783_v14, %v3405_v33  ;;  %vm1137_vm7 = vweird.f32 %v2783_v14 }
 0x228   :  { %v3424_v56 = vsel %vm836_vm5, %v832_v22, %v2714_v45  ;;  %v1147_v2 = vmul.f32 %v2785_v55, %v3409_v26  ;;  %v1169_v6 = vadd.f32 %v1168_v48, %v1167_v42  ;;  %vm1152_vm8 = vweird.f32 %v2785_v55  ;;  %vm3439_vm10 = vmor %vm1136_vm9, %vm1137_vm7 }
 0x229   :  { %v1163_v8 = vmul.f32 %v3306_v58, %v3424_v56  ;;  %v1133_v10 = vsub.f32 1.0, %v1132_v61  ;;  %vm1153_vm12 = vmor %vm1151_vm11, %vm1152_vm8 }
 0x22a   :  { %v1148_v12 = vsub.f32 1.0, %v1147_v2  ;;  %v1170_v9 = vrot.slane %v1169_v6, 2 }
 0x22b   :  { %v1174_v57 = vsel %vm114_vm0, %v1163_v8, 0.0  ;;  %v1134_v17 = vmul.f32 %v2783_v14, %v1133_v10  ;;  %v2904_v8 = vmov 4.0  }
 0x22c   :  { %v1149_v18 = vmul.f32 %v2785_v55, %v1148_v12  ;;  %v1171_v20 = vadd.f32 %v1170_v9, %v1169_v6  ;;  %2788 = vrcp.f32 %v2904_v8 }
 0x22d   :  { %v2787_v60 = vpop.eup %2786  ;;  %v1135_v23 = vadd.f32 %v2783_v14, %v1134_v17 }
 0x22e   :  { %v2715_v1 = vadd.f32 -1.0, %v2787_v60  ;;  %v1150_v25 = vadd.f32 %v2785_v55, %v1149_v18  ;;  %v1172_v27 = vrot.slane %v1171_v20, 1 }
 0x22f   :  { %v1139_v34 = vsel %vm3439_vm10, %v2783_v14, %v1135_v23 }
 0x230   :  { %v3430_v4 = vsel %vm837_vm6, %v833_v62, %v2715_v1  ;;  %v1154_v35 = vsel %vm1153_vm12, %v2785_v55, %v1150_v25  ;;  %v1173_v37 = vadd.f32 %v1172_v27, %v1171_v20  ;;  %v1144_v41 = vsel %vm1141_vm13, %v1143_v36, %v1139_v34 }
 0x231   :  { %v1164_v11 = vmul.f32 %v3302_v54, %v3430_v4  ;;  %v1159_v42 = vsel %vm1156_vm14, %v1158_v5, %v1154_v35  ;;  %v2752_v5 = vld [vmem:[%s3864_s12] ss:$0 sm:$0xff]  ;;  %s2698_s12 = sshll.u32 %s3872_s20, 4  ;;  %s2699_s12 = int_to_ptr.hbm [resolvable:$true] %s2698_s12 }
 0x232   :  { %v3448_v33 = vmul.f32 %v1173_v37, %v1144_v41  ;;  %v2789_v10 = vpop.eup %2788  ;;  %v2753_v41 = vld [vmem:[%s3865_s13] ss:$0 sm:$0xff] }
 0x233   :  { %v1175_v16 = vsel %vm114_vm0, %v1164_v11, 0.0  ;;  %v1391_v11 = vmul.f32 4.0, %v2789_v10  ;;  %vm1395_vm4 = vweird.f32 %v2789_v10 }
 0x234   :  { %v1176_v7 = vadd.f32 %v1175_v16, %v1174_v57 }
 0x235   :  { %v1392_v12 = vsub.f32 1.0, %v1391_v11 }
 0x236   :  { %v1177_v21 = vrot.slane %v1176_v7, 4 }
 0x237   :  { %v1393_v9 = vmul.f32 %v2789_v10, %v1392_v12 }
 0x238   :  { %v1178_v22 = vadd.f32 %v1177_v21, %v1176_v7 }
 0x239   :  { %v1394_v57 = vadd.f32 %v2789_v10, %v1393_v9 }
 0x23a   :  { %v1179_v24 = vrot.slane %v1178_v22, 2 }
 0x23b   :  { %v1396_v16 = vsel %vm1395_vm4, %v2789_v10, %v1394_v57 }
 0x23c   :  { %v1180_v15 = vadd.f32 %v1179_v24, %v1178_v22  ;;  %v1429_v22 = vld [vmem:[%s3866_s14] sm:$0xf] }
 0x23d   :  { %v1438_v23 = vsel %vm868_vm1, %v1429_v22, 0 }
 0x23e   :  { %v1181_v62 = vrot.slane %v1180_v15, 1  ;;  %v1455_v25 = vand.u32 4294901760, %v1438_v23 }
 0x240   :  { %v1182_v40 = vadd.f32 %v1181_v62, %v1180_v15  ;;  %v1482_v27 = vsub.f32 %v1438_v23, %v1455_v25  ;;  %1532 = vmatpush.msrb.mxu1 %v1455_v25 }
 0x242   :  { %v3450_v45 = vmul.f32 %v1182_v40, %v1159_v42  ;;  %1509 = vmatpush.msrb.mxu0 %v1482_v27  ;;  %v1483_v28 = vand.u32 4294901760, %v1482_v27 }
 0x244   :  { %v1196_v26 = vsel %vm1195_vm15, %v3450_v45, %v3448_v33  ;;  %v1484_v30 = vsub.f32 %v1482_v27, %v1483_v28 }
 0x245   :  { %v1197_v14 = vsel %vm114_vm0, %v1196_v26, 0 }
 0x246   :  { %v1219_v48 = vand.u32 4294901760, %v1197_v14  ;;  %v1485_v31 = vand.u32 4294901760, %v1484_v30 }
 0x248   :  { %v1220_v55 = vsub.f32 %v1197_v14, %v1219_v48  ;;  %1265 = vmatmul.f32.vlgmr.msrb.gmra.mxu3 %v1219_v48 }
 0x249   :  { %1372 = vmatpush.msrb.mxu3 %v3346_v38 }
 0x24a   :  { %v1221_v60 = vand.u32 4294901760, %v1220_v55 }
 0x24b   :  { %1374 = vmatpush.msrb.mxu3 %v3348_v52 }
 0x24c   :  { %v1222_v61 = vsub.f32 %v1220_v55, %v1221_v60 }
 0x24d   :  { %1376 = vmatpush.msrb.mxu3 %v3350_v39  ;;  %v2751_v39 = vld [vmem:[%s3863_s11] ss:$0 sm:$0xff] }
 0x24e   :  { %v1223_v1 = vand.u32 4294901760, %v1222_v61 }
 0x24f   :  { %1378 = vmatpush.msrb.mxu3 %v3355_v43 }
 0x250   :  { %1224 = vmatmul.f32.vlgmr.msrb.gmra.mxu2 %v1223_v1  ;;  %1322 = vmatmul.f32.vlgmr.msra.gmra.mxu3 %v1221_v60 }
 0x251   :  { %1341 = vmatpush.msrb.mxu2 %v1242_v63  ;;  %1486 = vmatpush.msra.mxu3 %v1485_v31 }
 0x253   :  { %1345 = vmatpush.msrb.mxu2 %v1248_v0 }
 0x255   :  { %1349 = vmatpush.msrb.mxu2 %v1254_v3 }
 0x257   :  { %1353 = vmatpush.msrb.mxu2 %v1260_v13 }
 0x258   :  { %1295 = vmatmul.f32.vlgmr.msra.gmra.mxu2 %v1220_v55  ;;  %1380 = vmatmul.f32.vlgmr.msrb.gmra.mxu3 %v1219_v48 }
 0x259   :  { %1456 = vmatpush.msra.mxu2 %v1455_v25  ;;  %1580 = vmatpush.msrb.mxu3 %v1455_v25  ;;  %v1589_v25 = vld [vmem:[%s3893_s5 + $0x8] sm:$0xff] }
 0x260   :  { %1355 = vmatmul.f32.vlgmr.msrb.gmra.mxu2 %v1219_v48 }
 0x261   :  { %1558 = vmatpush.msrb.mxu2 %v1483_v28  ;;  %v2754_v28 = vld [vmem:[%s3867_s15] ss:$0 sm:$0xff]  ;;  %s2905_s15 = smov 32  }
 0x2cb   :  { %v1266_v38 = vpop.f32.mrf.mxu3 }
 0x2d3   :  { %v1225_v52 = vpop.f32.mrf.mxu2  ;;  %v1323_v49 = vpop.f32.mrf.mxu3 }
 0x2d4   :  { %v1226_v43 = vadd.f32 %v2751_v39, %v1225_v52 }
 0x2d6   :  { %v1267_v50 = vadd.f32 %v1266_v38, %v1226_v43 }
 0x2db   :  { %v1296_v63 = vpop.f32.mrf.mxu2  ;;  %v1381_v6 = vpop.f32.mrf.mxu3 }
 0x2dc   :  { %v1297_v0 = vadd.f32 %v1296_v63, %v1267_v50  ;;  %v1592_v63 = vld [vmem:[%s3893_s5 + $0x20] sm:$0xff] }
 0x2dd   :  { %v1611_v50 = vand.u32 4294901760, %v1592_v63 }
 0x2de   :  { %v1324_v2 = vadd.f32 %v1323_v49, %v1297_v0  ;;  %v1590_v0 = vld [vmem:[%s3893_s5 + $0x10] sm:$0xff] }
 0x2df   :  { %1612 = vmatpush.msra.mxu0 %v1611_v50 }
 0x2e3   :  { %v1356_v51 = vpop.f32.mrf.mxu2 }
 0x2e4   :  { %v1357_v3 = vadd.f32 %v1356_v51, %v1324_v2  ;;  %v1640_v2 = vsub.f32 %v1592_v63, %v1611_v50  ;;  %v1613_v51 = vand.u32 4294901760, %v1590_v0 }
 0x2e6   :  { %v1382_v59 = vadd.f32 %v1381_v6, %v1357_v3  ;;  %v1588_v3 = vld [vmem:[%s3893_s5] sm:$0xff]  ;;  %v1641_v6 = vand.u32 4294901760, %v1640_v2  ;;  %1614 = vmatpush.msra.mxu0 %v1613_v51 }
 0x2e8   :  { %v1387_v13 = vsel %vm1386_vm3, %v1382_v59, 0.0  ;;  %v1642_v8 = vsub.f32 %v1640_v2, %v1641_v6 }
 0x2e9   :  { %1388 = vadd.xlane.f32.xlu2 %v1387_v13  ;;  %v1615_v13 = vand.u32 4294901760, %v1588_v3 }
 0x2ea   :  { %v1643_v12 = vand.u32 4294901760, %v1642_v8 }
 0x2eb   :  { %v1652_v11 = vsub.f32 %v1588_v3, %v1615_v13  ;;  %1616 = vmatpush.msra.mxu0 %v1615_v13 }
 0x2ec   :  { %1644 = vmatpush.msra.mxu1 %v1643_v12 }
 0x2ed   :  { %v1653_v57 = vand.u32 4294901760, %v1652_v11 }
 0x35c   :  { %v1389_v7 = vpop.xlane.xlu2 %1388 }
 0x35d   :  { %v1397_v17 = vmul.f32 %v1396_v16, %v1389_v7  ;;  %v1654_v7 = vsub.f32 %v1652_v11, %v1653_v57 }
 0x35f   :  { %v1398_v18 = vsub.f32 %v1382_v59, %v1397_v17  ;;  %v1646_v59 = vsub.f32 %v1590_v0, %v1613_v51  ;;  %v1593_v17 = vld [vmem:[%s3893_s5 + $0x28] sm:$0xff] }
 0x361   :  { %v1399_v20 = vmul.f32 %v1398_v18, %v1398_v18  ;;  %v1647_v10 = vand.u32 4294901760, %v1646_v59 }
 0x363   :  { %v1400_v21 = vsel %vm1386_vm3, %v1399_v20, 0.0  ;;  %v1648_v9 = vsub.f32 %v1646_v59, %v1647_v10  ;;  %v1783_v20 = vand.u32 4294901760, %v1593_v17 }
 0x364   :  { %1401 = vadd.xlane.f32.xlu2 %v1400_v21  ;;  %v1591_v21 = vld [vmem:[%s3893_s5 + $0x18] sm:$0xff] }
 0x365   :  { %v1812_v22 = vsub.f32 %v1593_v17, %v1783_v20  ;;  %v1785_v23 = vand.u32 4294901760, %v1591_v21 }
 0x367   :  { %v1813_v27 = vand.u32 4294901760, %v1812_v22 }
 0x3d7   :  { %v1402_v24 = vpop.xlane.xlu2 %1401 }
 0x3d8   :  { %v1403_v47 = vmul.f32 %v1402_v24, %v1396_v16  ;;  %v1649_v16 = vand.u32 4294901760, %v1648_v9  ;;  %v1787_v24 = vand.u32 4294901760, %v1589_v25 }
 0x3da   :  { %v1404_v19 = vadd.f32 1e-05, %v1403_v47  ;;  %1650 = vmatpush.msra.mxu1 %v1649_v16  ;;  %v1818_v47 = vsub.f32 %v1591_v21, %v1785_v23  ;;  %v1824_v31 = vsub.f32 %v1589_v25, %v1787_v24 }
 0x3dc   :  { %2790 = vrsqrt.f32 %v1404_v19  ;;  %vm1411_vm5 = vweird.f32 %v1404_v19  ;;  %v1819_v30 = vand.u32 4294901760, %v1818_v47 }
 0x3e2   :  { %v2791_v15 = vpop.eup %2790 }
 0x3e3   :  { %v1406_v34 = vmul.f32 %v2791_v15, %v1404_v19  ;;  %vm1412_vm1 = vweird.f32 %v2791_v15  ;;  %v1814_v19 = vsub.f32 %v1812_v22, %v1813_v27 }
 0x3e4   :  { %vm1413_vm6 = vmor %vm1411_vm5, %vm1412_vm1 }
 0x3e5   :  { %v1407_v35 = vmul.f32 %v2791_v15, %v1406_v34  ;;  %v1820_v34 = vsub.f32 %v1818_v47, %v1819_v30 }
 0x3e7   :  { %v1408_v37 = vmul.f32 0.5, %v1407_v35  ;;  %v1825_v35 = vand.u32 4294901760, %v1824_v31 }
 0x3e9   :  { %v1409_v62 = vsub.f32 1.5, %v1408_v37 }
 0x3eb   :  { %v1410_v36 = vmul.f32 %v2791_v15, %v1409_v62 }
 0x3ed   :  { %v1414_v40 = vsel %vm1413_vm6, %v2791_v15, %v1410_v36  ;;  %v1815_v15 = vand.u32 4294901760, %v1814_v19 }
 0x3ee   :  { %v1415_v42 = vmul.f32 %v1414_v40, %v1398_v18  ;;  %v1655_v18 = vand.u32 4294901760, %v1654_v7  ;;  %v1826_v40 = vsub.f32 %v1824_v31, %v1825_v35 }
 0x3f0   :  { %v1419_v26 = vmul.f32 %v2752_v5, %v1415_v42  ;;  %1656 = vmatpush.msra.mxu1 %v1655_v18  ;;  %v1821_v5 = vand.u32 4294901760, %v1820_v34  ;;  %v1827_v42 = vand.u32 4294901760, %v1826_v40  ;;  %v1945_v34 = vlaneseq }
 0x3f2   :  { %v1423_v14 = vadd.f32 %v2753_v41, %v1419_v26 }
 0x3f4   :  { %v1425_v48 = vmul.f32 1.442695, %v1423_v14  ;;  %vm1424_vm7 = vcmp.gt.f32.partialorder %v1423_v14, 0.0 }
 0x3f6   :  { %2792 = vpow2.f32 %v1425_v48 }
 0x3fc   :  { %v2793_v55 = vpop.eup %2792 }
 0x3fd   :  { %v2716_v60 = vadd.f32 -1.0, %v2793_v55 }
 0x3ff   :  { %v1428_v61 = vsel %vm1424_vm7, %v1423_v14, %v2716_v60 }
 0x400   :  { %v1435_v1 = vsel %vm855_vm2, %v1428_v61, 0  ;;  %vm1594_vm2 = vcmask 195584  }
 0x401   :  { %v1457_v38 = vand.u32 4294901760, %v1435_v1 }
 0x403   :  { %1488 = vmatmul.f32.vlgmr.msra.gmra.mxu3 %v1457_v38  ;;  %v1458_v52 = vsub.f32 %v1435_v1, %v1457_v38 }
 0x404   :  { %1704 = vmatpush.msra.mxu3 %v1611_v50 }
 0x405   :  { %1512 = vmatmul.f32.vlgmr.msrb.gmra.mxu0 %v1458_v52  ;;  %v1459_v39 = vand.u32 4294901760, %v1458_v52 }
 0x406   :  { %1706 = vmatpush.msra.mxu3 %v1613_v51  ;;  %1732 = vmatpush.msrb.mxu0 %v1641_v6 }
 0x407   :  { %1536 = vmatmul.f32.vlgmr.msrb.gmra.mxu1 %v1459_v39  ;;  %v1460_v43 = vsub.f32 %v1458_v52, %v1459_v39 }
 0x408   :  { %1708 = vmatpush.msra.mxu3 %v1615_v13  ;;  %1736 = vmatpush.msrb.mxu0 %v1647_v10 }
 0x409   :  { %v1461_v49 = vand.u32 4294901760, %v1460_v43  ;;  %1760 = vmatpush.msrb.mxu1 %v1611_v50 }
 0x40a   :  { %1740 = vmatpush.msrb.mxu0 %v1653_v57 }
 0x40b   :  { %1462 = vmatmul.f32.vlgmr.msra.gmra.mxu2 %v1461_v49  ;;  %1582 = vmatmul.f32.vlgmr.msrb.gmra.mxu3 %v1457_v38 }
 0x40c   :  { %1677 = vmatpush.msra.mxu2 %v1640_v2  ;;  %1762 = vmatpush.msrb.mxu1 %v1613_v51 }
 0x40d   :  { %1816 = vmatpush.msrb.mxu3 %v1815_v15 }
 0x40e   :  { %1680 = vmatpush.msra.mxu2 %v1646_v59  ;;  %1764 = vmatpush.msrb.mxu1 %v1615_v13 }
 0x40f   :  { %1822 = vmatpush.msrb.mxu3 %v1821_v5 }
 0x410   :  { %1683 = vmatpush.msra.mxu2 %v1652_v11 }
 0x411   :  { %1828 = vmatpush.msrb.mxu3 %v1827_v42 }
 0x413   :  { %1560 = vmatmul.f32.vlgmr.msrb.gmra.mxu2 %v1457_v38 }
 0x414   :  { %1784 = vmatpush.msrb.mxu2 %v1783_v20 }
 0x416   :  { %1786 = vmatpush.msrb.mxu2 %v1785_v23 }
 0x418   :  { %1788 = vmatpush.msrb.mxu2 %v1787_v24 }
 0x482   :  { %v1513_v26 = vpop.f32.mrf.mxu0 }
 0x484   :  { %v1537_v48 = vpop.f32.mrf.mxu1 }
 0x486   :  { %v1489_v37 = vpop.f32.mrf.mxu3 }
 0x48e   :  { %v1463_v62 = vpop.f32.mrf.mxu2  ;;  %v1583_v1 = vpop.f32.mrf.mxu3 }
 0x48f   :  { %v1464_v36 = vadd.f32 %v2754_v28, %v1463_v62 }
 0x491   :  { %v1490_v41 = vadd.f32 %v1489_v37, %v1464_v36 }
 0x493   :  { %v1514_v14 = vadd.f32 %v1513_v26, %v1490_v41  ;;  %v2908_v41 = vmov 0.0  }
 0x495   :  { %v1538_v55 = vadd.f32 %v1537_v48, %v1514_v14  ;;  %v2090_v14 = vrot.slane %v3306_v58, 1 }
 0x496   :  { %v1561_v60 = vpop.f32.mrf.mxu2 }
 0x497   :  { %v1562_v61 = vadd.f32 %v1561_v60, %v1538_v55  ;;  %v1962_v55 = vrot.slane %v3306_v58, 6  ;;  %v2143_v60 = vrot.slane %v3306_v58, 2 }
 0x499   :  { %v1584_v38 = vadd.f32 %v1583_v1, %v1562_v61  ;;  %v2089_v61 = vrot.slane %v3298_v46, 1  ;;  %v2091_v1 = vrot.slane %v3302_v54, 1 }
 0x49b   :  { %v1586_v52 = vmul.f32 1.442695, %v1584_v38  ;;  %v2012_v38 = vrot.slane %v3302_v54, 7 }
 0x49d   :  { %2794 = vpow2.f32 %v1586_v52  ;;  %v2011_v52 = vrot.slane %v3306_v58, 7 }
 0x4a3   :  { %v2795_v39 = vpop.eup %2794 }
 0x4a4   :  { %v1596_v43 = vsel %vm1594_vm2, %v2795_v39, 0  ;;  %v2010_v39 = vrot.slane %v3298_v46, 7 }
 0x4a5   :  { %v1617_v49 = vand.u32 4294901760, %v1596_v43 }
 0x4a7   :  { %1658 = vmatmul.f32.vlgmr.msra.gmra.mxu1 %v1617_v49  ;;  %v1618_v63 = vsub.f32 %v1596_v43, %v1617_v49  ;;  %v1961_v43 = vrot.slane %v3298_v46, 6 }
 0x4a8   :  { %1876 = vmatpush.msra.mxu1 %v1783_v20 }
 0x4a9   :  { %1686 = vmatmul.f32.vlgmr.msra.gmra.mxu2 %v1618_v63  ;;  %v1619_v50 = vand.u32 4294901760, %v1618_v63 }
 0x4aa   :  { %1878 = vmatpush.msra.mxu1 %v1785_v23  ;;  %1904 = vmatpush.msra.mxu2 %v1813_v27 }
 0x4ab   :  { %1712 = vmatmul.f32.vlgmr.msra.gmra.mxu3 %v1619_v50  ;;  %v1620_v0 = vsub.f32 %v1618_v63, %v1619_v50 }
 0x4ac   :  { %1880 = vmatpush.msra.mxu1 %v1787_v24  ;;  %1908 = vmatpush.msra.mxu2 %v1819_v30 }
 0x4ad   :  { %v1621_v2 = vand.u32 4294901760, %v1620_v0  ;;  %1932 = vmatpush.msra.mxu3 %v1783_v20  ;;  %v2009_v0 = vrot.slane %v3300_v53, 7 }
 0x4ae   :  { %1912 = vmatpush.msra.mxu2 %v1825_v35  ;;  %v3526_v35 = vshrl.u32 %v1945_v34, 7  ;;  %v2023_v34 = vrot.slane %v3403_v32, 7 }
 0x4af   :  { %1622 = vmatmul.f32.vlgmr.msra.gmra.mxu0 %v1621_v2  ;;  %1766 = vmatmul.f32.vlgmr.msrb.gmra.mxu1 %v1617_v49 }
 0x4b0   :  { %1849 = vmatpush.msra.mxu0 %v1812_v22  ;;  %1934 = vmatpush.msra.mxu3 %v1785_v23  ;;  %v1947_v37 = vadd.s32 8, %v3526_v35  ;;  %v1997_v36 = vadd.s32 4294967295, %v3526_v35  ;;  %v1948_v5 = vadd.s32 4294967294, %v3526_v35  ;;  %vm2092_vm11 = vcmp.lt.s32.totalorder %v3526_v35, 7 }
 0x4b1   :  { %1794 = vmatmul.f32.vlgmr.msrb.gmra.mxu2 %v1621_v2  ;;  %vm2013_vm12 = vcmp.lt.s32.totalorder %v3526_v35, 1  ;;  %vm1964_vm13 = vcmp.lt.s32.totalorder %v3526_v35, 2  ;;  %vm2145_vm15 = vcmp.lt.s32.totalorder %v3526_v35, 6  ;;  %v1960_v2 = vrot.slane %v3300_v53, 6 }
 0x4b2   :  { %1852 = vmatpush.msra.mxu0 %v1818_v47  ;;  %1936 = vmatpush.msra.mxu3 %v1787_v24  ;;  %v2077_v62 = vadd.s32 1, %v1947_v37  ;;  %v2130_v40 = vadd.s32 2, %v1947_v37  ;;  %vm1999_vm9 = vcmp.ge.s32.totalorder %v1997_v36, 0  ;;  %vm1950_vm10 = vcmp.ge.s32.totalorder %v1948_v5, 0 }
 0x4b3   :  { %1830 = vmatmul.f32.vlgmr.msrb.gmra.mxu3 %v1617_v49  ;;  %v2718_v26 = vsel %vm1999_vm9, 1.0, %v2908_v41  ;;  %v2717_v48 = vsel %vm1950_vm10, 1.0, %v2908_v41  ;;  %v1974_v37 = vrot.slane %v3403_v32, 6  ;;  %v3877_v36 = vrot.slane %v3430_v4, 7 }
 0x4b4   :  { %1855 = vmatpush.msra.mxu0 %v1824_v31  ;;  %vm2081_vm8 = vcmp.lt.s32.totalorder %v2077_v62, 16  ;;  %vm2134_vm14 = vcmp.lt.s32.totalorder %v2130_v40, 16  ;;  %v2155_v40 = vrot.slane %v3403_v32, 2 }
 0x4b5   :  { %v2719_v42 = vsel %vm2081_vm8, 1.0, %v2908_v41 }
 0x4b7   :  { %1742 = vmatmul.f32.vlgmr.msrb.gmra.mxu0 %v1617_v49  ;;  %1884 = vmatmul.f32.vlgmr.msra.gmra.mxu1 %v1619_v50  ;;  %v2088_v50 = vrot.slane %v3300_v53, 1 }
 0x4b9   :  { %1914 = vmatmul.f32.vlgmr.msra.gmra.mxu2 %v1617_v49 }
 0x4bb   :  { %1938 = vmatmul.f32.vlgmr.msra.gmra.mxu3 %v1617_v49  ;;  %v2720_v49 = vsel %vm2134_vm14, 1.0, %v2908_v41 }
 0x4bf   :  { %1858 = vmatmul.f32.vlgmr.msra.gmra.mxu0 %v1618_v63  ;;  %v2142_v63 = vrot.slane %v3298_v46, 2 }
 0x524   :  { %v1659_v51 = vpop.f32.mrf.mxu1 }
 0x52c   :  { %v1623_v3 = vpop.f32.mrf.mxu0  ;;  %v1687_v6 = vpop.f32.mrf.mxu2 }
 0x52d   :  { %v1660_v59 = vadd.f32 %v1659_v51, %v1623_v3  ;;  %v1767_v11 = vpop.f32.mrf.mxu1  ;;  %v1963_v51 = vrot.slane %v3302_v54, 6  ;;  %v2094_v3 = vsel %vm2092_vm11, %v2089_v61, %v2090_v14 }
 0x52e   :  { %v1713_v13 = vpop.f32.mrf.mxu3 }
 0x52f   :  { %v1688_v8 = vadd.f32 %v1687_v6, %v1660_v59  ;;  %v1966_v6 = vsel %vm1964_vm13, %v1961_v43, %v1962_v55  ;;  %v2141_v59 = vrot.slane %v3300_v53, 2  ;;  %v3596_v62 = vsel %vm1964_vm13, %v1962_v55, %v1963_v51 }
 0x530   :  { %v3878_v55 = vrot.slane %v3399_v29, 2 }
 0x531   :  { %v1714_v10 = vadd.f32 %v1713_v13, %v1688_v8  ;;  %v2147_v13 = vsel %vm2145_vm15, %v2142_v63, %v2143_v60  ;;  %v3558_v8 = vsel %vm2092_vm11, %v2088_v50, %v2089_v61  ;;  %v3879_v61 = vrot.slane %v3430_v4, 6 }
 0x534   :  { %v1743_v12 = vpop.f32.mrf.mxu0  ;;  %v1795_v57 = vpop.f32.mrf.mxu2 }
 0x535   :  { %v1744_v9 = vadd.f32 %v1743_v12, %v1714_v10  ;;  %v1885_v23 = vpop.f32.mrf.mxu1  ;;  %v2096_v10 = vsel %vm2092_vm11, %v2091_v1, %v2088_v50  ;;  %v2015_v12 = vsel %vm2013_vm12, %v2010_v39, %v2011_v52 }
 0x536   :  { %v1831_v7 = vpop.f32.mrf.mxu3 }
 0x537   :  { %v3504_v16 = vadd.f32 %v1767_v11, %v1744_v9  ;;  %v1832_v18 = vadd.f32 %v1831_v7, %v1795_v57  ;;  %v2017_v11 = vsel %vm2013_vm12, %v2012_v38, %v2009_v0  ;;  %v2016_v9 = vsel %vm2013_vm12, %v2009_v0, %v2010_v39  ;;  %v2268_v0 = vld [vmem:[#allocation5 + $0x10] sm:$0xff] }
 0x538   :  { %v1967_v57 = vsel %vm1964_vm13, %v1960_v2, %v1961_v43  ;;  %v3572_v7 = vsel %vm2145_vm15, %v2141_v59, %v2142_v63  ;;  %v3613_v43 = vsel %vm2013_vm12, %v2011_v52, %v2012_v38 }
 0x539   :  { %v3507_v17 = vperm.slane %v3504_v16, 0  ;;  %v3881_v21 = vrot.slane %v3504_v16, 1 }
 0x53b   :  { %2052 = vrot.lane.b32.xlu2 %v3507_v17, %s2905_s15  ;;  %2030 = vrot.lane.b32.xlu1 %v3507_v17, %s2906_s3  ;;  %v3515_v24 = vperm.slane %v3881_v21, 0 }
 0x53c   :  { %1983 = vrot.lane.b32.xlu0 %v3507_v17, %s2907_s10  ;;  %v1859_v20 = vpop.f32.mrf.mxu0  ;;  %v1915_v27 = vpop.f32.mrf.mxu2 }
 0x53d   :  { %v1860_v22 = vadd.f32 %v1859_v20, %v1832_v18  ;;  %v2144_v18 = vrot.slane %v3302_v54, 2  ;;  %v3575_v20 = vmul.f32 %v2719_v42, %v2094_v3  ;;  %v3645_v3 = vsel %vm2145_vm15, %v3878_v55, %v2155_v40 }
 0x53e   :  { %v1939_v28 = vpop.f32.mrf.mxu3 }
 0x53f   :  { %v1886_v25 = vadd.f32 %v1885_v23, %v1860_v22  ;;  %v1968_v22 = vsel %vm1964_vm13, %v1963_v51, %v1960_v2  ;;  %v3579_v23 = vmul.f32 %v2717_v48, %v1966_v6  ;;  %v2149_v41 = vsel %vm2145_vm15, %v2144_v18, %v2141_v59 }
 0x540   :  { %v1969_v5 = vmul.f32 %v2717_v48, %v1968_v22  ;;  %v3609_v48 = vsel %vm2145_vm15, %v2143_v60, %v2144_v18  ;;  %v3633_v52 = vmul.f32 %v2720_v49, %v2149_v41  ;;  %v3648_v59 = vand.u32 4294901760, %v2268_v0  ;;  %v2267_v18 = vld [vmem:[#allocation5 + $0x8] sm:$0xff] }
 0x541   :  { %v1916_v47 = vadd.f32 %v1915_v27, %v1886_v25  ;;  %v3581_v25 = vmul.f32 %v2720_v49, %v2147_v13  ;;  %v3585_v27 = vsel %vm2092_vm11, %v2090_v14, %v2091_v1  ;;  %v1973_v14 = vrot.slane %v3399_v29, 6  ;;  %v2269_v1 = vld [vmem:[#allocation5 + $0x18] sm:$0xff] }
 0x542   :  { %v3615_v63 = vand.u32 4294901760, %v2269_v1 }
 0x543   :  { %v1940_v19 = vadd.f32 %v1939_v28, %v1916_v47  ;;  %2054 = vrot.lane.b32.xlu2 %v3515_v24, %s2905_s15  ;;  %1985 = vrot.lane.b32.xlu1 %v3515_v24, %s2907_s10  ;;  %v3587_v47 = vmul.f32 %v2719_v42, %v2096_v10  ;;  %v2018_v28 = vmul.f32 %v2718_v26, %v2017_v11  ;;  %v3880_v42 = vrot.slane %v3399_v29, 1 }
 0x544   :  { %v1979_v38 = vsel %vm1964_vm13, %v1973_v14, %v1974_v37  ;;  %v2352_v6 = vsub.f32 %v2269_v1, %v3615_v63  ;;  %2450 = vmatpush.msrb.mxu3 %v3615_v63  ;;  %2299 = vmatpush.msrb.mxu0 %v3615_v63  ;;  %v1980_v11 = vsel %vm1964_vm13, %v3879_v61, %v1973_v14 }
 0x545   :  { %v2075_v30 = vrot.slane %v1940_v19, 1  ;;  %v3519_v31 = vperm.slane %v1940_v19, 0  ;;  %v3589_v19 = vmul.f32 %v2718_v26, %v2015_v12  ;;  %v2022_v26 = vrot.slane %v3399_v29, 7 }
 0x546   :  { %v2358_v1 = vsub.f32 %v2268_v0, %v3648_v59  ;;  %2406 = vmatpush.msrb.mxu2 %v2352_v6  ;;  %2452 = vmatpush.msrb.mxu3 %v3648_v59 }
 0x547   :  { %2162 = vrot.lane.b32.xlu0 %v3519_v31, %s2907_s10  ;;  %v3522_v15 = vperm.slane %v2075_v30, 0  ;;  %v2102_v30 = vrot.slane %v3403_v32, 1  ;;  %v2028_v60 = vsel %vm2013_vm12, %v2022_v26, %v2023_v34  ;;  %v2029_v2 = vsel %vm2013_vm12, %v3877_v36, %v2022_v26  ;;  %2301 = vmatpush.msrb.mxu0 %v3648_v59 }
 0x548   :  { %v2353_v26 = vand.u32 4294901760, %v2352_v6  ;;  %2409 = vmatpush.msrb.mxu2 %v2358_v1 }
 0x549   :  { %v3623_v50 = vsel %vm2092_vm11, %v3880_v42, %v2102_v30 }
 0x54b   :  { %2164 = vrot.lane.b32.xlu1 %v3522_v15, %s2907_s10 }
 0x54f   :  { %2032 = vrot.lane.b32.xlu0 %v3515_v24, %s2906_s3 }
 0x595   :  { %v2053_v39 = vpop.permute.xlu2 %2052 }
 0x596   :  { %v2058_v49 = vmul.f32 %v2053_v39, %v3300_v53  ;;  %v2059_v36 = vmul.f32 %v2053_v39, %v3298_v46  ;;  %v2103_v46 = vrot.slane %v3424_v56, 1 }
 0x5ad   :  { %v2031_v51 = vpop.permute.xlu1 %2030 }
 0x5ae   :  { %v2036_v13 = vmul.f32 %v2031_v51, %v2018_v28  ;;  %v2037_v10 = vmul.f32 %v2031_v51, %v2016_v9  ;;  %v1984_v12 = vpop.permute.xlu0 %1983  ;;  %v3660_v9 = vand.u32 4294901760, %v2267_v18  ;;  %v2266_v51 = vld [vmem:[#allocation5] sm:$0xff] }
 0x5af   :  { %v1989_v22 = vmul.f32 %v1984_v12, %v1969_v5  ;;  %v1990_v41 = vmul.f32 %v1984_v12, %v1967_v57  ;;  %v2354_v57 = vsub.f32 %v2352_v6, %v2353_v26  ;;  %v2359_v12 = vand.u32 4294901760, %v2358_v1 }
 0x5b0   :  { %v2044_v53 = vmul.f32 %v2036_v13, %v2029_v2  ;;  %v2045_v28 = vmul.f32 %v2037_v10, %v2028_v60  ;;  %v2364_v0 = vsub.f32 %v2267_v18, %v3660_v9  ;;  %v3664_v42 = vand.u32 4294901760, %v2266_v51  ;;  %2454 = vmatpush.msrb.mxu3 %v3660_v9  ;;  %2303 = vmatpush.msrb.mxu0 %v3660_v9 }
 0x5b1   :  { %v1993_v14 = vmul.f32 %v1989_v22, %v1980_v11  ;;  %v1994_v55 = vmul.f32 %v1990_v41, %v1979_v38  ;;  %v2040_v61 = vadd.f32 %v2036_v13, %v1989_v22  ;;  %v2041_v5 = vadd.f32 %v2037_v10, %v1990_v41 }
 0x5b2   :  { %v2156_v2 = vrot.slane %v3424_v56, 2  ;;  %v2355_v38 = vand.u32 4294901760, %v2354_v57  ;;  %v2360_v13 = vsub.f32 %v2358_v1, %v2359_v12  ;;  %v2365_v10 = vand.u32 4294901760, %v2364_v0  ;;  %2412 = vmatpush.msrb.mxu2 %v2364_v0  ;;  %2456 = vmatpush.msrb.mxu3 %v3664_v42 }
 0x5b3   :  { %v2048_v39 = vadd.f32 %v2044_v53, %v1993_v14  ;;  %v2049_v60 = vadd.f32 %v2045_v28, %v1994_v55  ;;  %v2370_v6 = vsub.f32 %v2266_v51, %v3664_v42  ;;  %v2113_v11 = vmul.f32 %v3519_v31, %v3558_v8  ;;  %2305 = vmatpush.msrb.mxu0 %v3664_v42 }
 0x5b4   :  { %v2114_v18 = vmul.f32 %v3519_v31, %v3575_v20  ;;  %v2066_v22 = vmul.f32 %v2058_v49, %v3399_v29  ;;  %v2067_v55 = vmul.f32 %v2059_v36, %v3403_v32  ;;  %v2062_v41 = vadd.f32 %v2058_v49, %v2040_v61  ;;  %2356 = vmatpush.msrb.mxu1 %v2355_v38 }
 0x5b5   :  { %v2063_v1 = vadd.f32 %v2059_v36, %v2041_v5  ;;  %v1986_v53 = vpop.permute.xlu1 %1985  ;;  %v2361_v28 = vand.u32 4294901760, %v2360_v13  ;;  %v2366_v51 = vsub.f32 %v2364_v0, %v2365_v10  ;;  %2415 = vmatpush.msrb.mxu2 %v2370_v6  ;;  %v1975_v8 = vrot.slane %v3424_v56, 6  ;;  %2497 = vmatpush.msra.mxu0 %v2353_v26 }
 0x5b6   :  { %v2070_v14 = vadd.f32 %v2066_v22, %v2048_v39  ;;  %v2071_v57 = vadd.f32 %v2067_v55, %v2049_v60  ;;  %v2371_v21 = vand.u32 4294901760, %v2370_v6  ;;  %v2106_v31 = vsel %vm2092_vm11, %v2102_v30, %v2103_v46 }
 0x5b7   :  { %v2159_v20 = vsel %vm2145_vm15, %v2155_v40, %v2156_v2  ;;  %v2024_v36 = vrot.slane %v3424_v56, 7  ;;  %2362 = vmatpush.msrb.mxu1 %v2361_v28  ;;  %v2367_v61 = vand.u32 4294901760, %v2366_v51  ;;  %v2184_v49 = vmul.f32 %v3504_v16, %v3448_v33  ;;  %2501 = vmatpush.msra.mxu0 %v2359_v12 }
 0x5b8   :  { %v2121_v26 = vmul.f32 %v2113_v11, %v3623_v50  ;;  %v2122_v5 = vmul.f32 %v2114_v18, %v2106_v31  ;;  %v2372_v39 = vsub.f32 %v2370_v6, %v2371_v21  ;;  %v2117_v30 = vadd.f32 %v2113_v11, %v2062_v41 }
 0x5b9   :  { %v2163_v0 = vpop.permute.xlu0 %2162  ;;  %v2118_v60 = vadd.f32 %v2114_v18, %v2063_v1  ;;  %2368 = vmatpush.msrb.mxu1 %v2367_v61  ;;  %v2104_v40 = vrot.slane %v3430_v4, 1  ;;  %2505 = vmatpush.msra.mxu0 %v2365_v10  ;;  %v2188_v6 = vperm.slane %v2184_v49, 0  ;;  %v2027_v12 = vsel %vm2013_vm12, %v2023_v34, %v2024_v36  ;;  %v2055_v1 = vpop.permute.xlu2 %2054 }
 0x5ba   :  { %v2168_v38 = vmul.f32 %v2163_v0, %v3572_v7  ;;  %v2169_v13 = vmul.f32 %v2163_v0, %v3581_v25  ;;  %v2125_v22 = vadd.f32 %v2121_v26, %v2070_v14  ;;  %v2126_v55 = vadd.f32 %v2122_v5, %v2071_v57 }
 0x5bb   :  { %v2373_v28 = vand.u32 4294901760, %v2372_v39  ;;  %v1978_v7 = vsel %vm1964_vm13, %v1974_v37, %v1975_v8  ;;  %v2157_v25 = vrot.slane %v3430_v4, 2  ;;  %2509 = vmatpush.msra.mxu0 %v2371_v21  ;;  %v3894_v37 = vrot.slane %v3504_v16, 1 }
 0x5bc   :  { %v2172_v33 = vadd.f32 %v2168_v38, %v2117_v30  ;;  %v2173_v51 = vadd.f32 %v2169_v13, %v2118_v60  ;;  %v2176_v50 = vmul.f32 %v2168_v38, %v3645_v3  ;;  %v2177_v31 = vmul.f32 %v2169_v13, %v2159_v20 }
 0x5bd   :  { %2374 = vmatpush.msrb.mxu1 %v2373_v28  ;;  %v3715_v41 = vmul.f32 %v3894_v37, %v3450_v45  ;;  %v2105_v32 = vsel %vm2092_vm11, %v2103_v46, %v2104_v40  ;;  %v3895_v21 = vrot.slane %v3399_v29, 1  ;;  %v2165_v46 = vpop.permute.xlu1 %2164  ;;  %v2115_v20 = vmul.f32 %v3522_v15, %v3585_v27 }
 0x5be   :  { %v2180_v10 = vadd.f32 %v2176_v50, %v2125_v22  ;;  %v2181_v11 = vadd.f32 %v2177_v31, %v2126_v55  ;;  %v2198_v3 = vadd.f32 %v2172_v33, %v3507_v17  ;;  %v2199_v18 = vadd.f32 %v2173_v51, %v3507_v17 }
 0x5bf   :  { %2540 = vmatpush.msra.mxu1 %v3615_v63  ;;  %v2108_v34 = vsel %vm2092_vm11, %v2104_v40, %v3895_v21  ;;  %v3896_v17 = vrot.slane %v3430_v4, 6  ;;  %v2116_v61 = vmul.f32 %v3522_v15, %v3587_v47  ;;  %v1991_v49 = vmul.f32 %v1986_v53, %v3579_v23 }
 0x5c0   :  { %v3729_v14 = vadd.f32 %v2188_v6, %v2180_v10  ;;  %v3731_v45 = vadd.f32 %v2188_v6, %v2181_v11  ;;  %v3733_v16 = vadd.f32 1e-05, %v2198_v3  ;;  %v3735_v57 = vadd.f32 1e-05, %v2199_v18 }
 0x5c1   :  { %v1977_v63 = vsel %vm1964_vm13, %v1975_v8, %v3896_v17  ;;  %2542 = vmatpush.msra.mxu1 %v3648_v59  ;;  %v1992_v8 = vmul.f32 %v1986_v53, %v3596_v62  ;;  %v2033_v26 = vpop.permute.xlu0 %2032  ;;  %v2060_v5 = vmul.f32 %v2055_v1, %v3306_v58  ;;  %v2158_v59 = vsel %vm2145_vm15, %v2156_v2, %v2157_v25 }
 0x5c2   :  { %2796 = vrcp.f32 %v3733_v16  ;;  %v3897_v0 = vrot.slane %v3399_v29, 2  ;;  %v2061_v15 = vmul.f32 %v2055_v1, %v3302_v54  ;;  %v2170_v58 = vmul.f32 %v2165_v46, %v3609_v48 }
 0x5c3   :  { %2544 = vmatpush.msra.mxu1 %v3660_v9  ;;  %2798 = vrcp.f32 %v3735_v57  ;;  %v2171_v23 = vmul.f32 %v2165_v46, %v3633_v52  ;;  %v2189_v47 = vperm.slane %v3715_v41, 0  ;;  %v3898_v62 = vrot.slane %v3430_v4, 7 }
 0x5c4   :  { %v2161_v27 = vsel %vm2145_vm15, %v2157_v25, %v3897_v0  ;;  %v2038_v2 = vmul.f32 %v2033_v26, %v3589_v19  ;;  %v2039_v53 = vmul.f32 %v2033_v26, %v3613_v43  ;;  %v2123_v54 = vmul.f32 %v2115_v20, %v2105_v32 }
 0x5c5   :  { %v2026_v29 = vsel %vm2013_vm12, %v2024_v36, %v3898_v62  ;;  %2546 = vmatpush.msra.mxu1 %v3664_v42  ;;  %v2124_v9 = vmul.f32 %v2116_v61, %v2108_v34  ;;  %v1995_v39 = vmul.f32 %v1991_v49, %v1978_v7  ;;  %v1996_v30 = vmul.f32 %v1992_v8, %v1977_v63 }
 0x5c6   :  { %v2042_v48 = vadd.f32 %v2038_v2, %v1991_v49  ;;  %v2043_v60 = vadd.f32 %v2039_v53, %v1992_v8  ;;  %v2046_v52 = vmul.f32 %v2038_v2, %v2027_v12  ;;  %v2047_v38 = vmul.f32 %v2039_v53, %v2026_v29 }
 0x5c7   :  { %v2068_v13 = vmul.f32 %v2060_v5, %v3424_v56  ;;  %v2069_v40 = vmul.f32 %v2061_v15, %v3430_v4  ;;  %v2178_v35 = vmul.f32 %v2170_v58, %v2158_v59  ;;  %v2179_v36 = vmul.f32 %v2171_v23, %v2161_v27 }
 0x5c8   :  { %v2797_v22 = vpop.eup %2796  ;;  %v2050_v19 = vadd.f32 %v2046_v52, %v1995_v39  ;;  %v2051_v55 = vadd.f32 %v2047_v38, %v1996_v30  ;;  %v2064_v43 = vadd.f32 %v2060_v5, %v2042_v48  ;;  %v2065_v28 = vadd.f32 %v2061_v15, %v2043_v60 }
 0x5c9   :  { %v2799_v42 = vpop.eup %2798  ;;  %v2207_v33 = vmul.f32 %v2797_v22, %v3733_v16  ;;  %vm2211_vm3 = vweird.f32 %v3733_v16  ;;  %v2215_v51 = vand.u32 2147483647, %v3733_v16  ;;  %v2217_v50 = vand.u32 2147483648, %v3733_v16 }
 0x5ca   :  { %v2222_v56 = vmul.f32 %v2799_v42, %v3735_v57  ;;  %vm2226_vm4 = vweird.f32 %v3735_v57  ;;  %v2072_v4 = vadd.f32 %v2068_v13, %v2050_v19  ;;  %v2073_v31 = vadd.f32 %v2069_v40, %v2051_v55 }
 0x5cb   :  { %v2208_v6 = vsub.f32 1.0, %v2207_v33  ;;  %v2230_v7 = vand.u32 2147483647, %v3735_v57  ;;  %v2119_v25 = vadd.f32 %v2115_v20, %v2064_v43  ;;  %v2120_v12 = vadd.f32 %v2116_v61, %v2065_v28 }
 0x5cc   :  { %v2223_v10 = vsub.f32 1.0, %v2222_v56  ;;  %v2232_v11 = vand.u32 2147483648, %v3735_v57  ;;  %v2127_v3 = vadd.f32 %v2123_v54, %v2072_v4  ;;  %v2128_v18 = vadd.f32 %v2124_v9, %v2073_v31 }
 0x5cd   :  { %v2209_v37 = vmul.f32 %v2797_v22, %v2208_v6  ;;  %vm2212_vm1 = vweird.f32 %v2797_v22  ;;  %v2174_v41 = vadd.f32 %v2170_v58, %v2119_v25  ;;  %v2175_v32 = vadd.f32 %v2171_v23, %v2120_v12 }
 0x5ce   :  { %v2224_v21 = vmul.f32 %v2799_v42, %v2223_v10  ;;  %vm2227_vm5 = vweird.f32 %v2799_v42  ;;  %v2182_v34 = vadd.f32 %v2178_v35, %v2127_v3  ;;  %v2183_v1 = vadd.f32 %v2179_v36, %v2128_v18  ;;  %vm2213_vm7 = vmor %vm2211_vm3, %vm2212_vm1 }
 0x5cf   :  { %v2210_v17 = vadd.f32 %v2797_v22, %v2209_v37  ;;  %vm2216_vm6 = vcmp.eq.f32.partialorder %v2215_v51, 8.507059e+37  ;;  %v2200_v63 = vadd.f32 %v2174_v41, %v3515_v24  ;;  %v2201_v46 = vadd.f32 %v2175_v32, %v3515_v24  ;;  %vm2228_vm2 = vmor %vm2226_vm4, %vm2227_vm5 }
 0x5d0   :  { %v2218_v20 = vor.u32 1.1754944e-38, %v2217_v50  ;;  %v2225_v61 = vadd.f32 %v2799_v42, %v2224_v21  ;;  %v2194_v49 = vadd.f32 %v2189_v47, %v2182_v34  ;;  %v2195_v8 = vadd.f32 %v2189_v47, %v2183_v1 }
 0x5d1   :  { %v2214_v26 = vsel %vm2213_vm7, %v2797_v22, %v2210_v17  ;;  %v2233_v5 = vor.u32 1.1754944e-38, %v2232_v11  ;;  %v2204_v59 = vadd.f32 1e-05, %v2200_v63  ;;  %v2205_v0 = vadd.f32 1e-05, %v2201_v46 }
 0x5d2   :  { %v2219_v27 = vsel %vm2216_vm6, %v2218_v20, %v2214_v26  ;;  %v2229_v15 = vsel %vm2228_vm2, %v2799_v42, %v2225_v61  ;;  %vm2231_vm8 = vcmp.eq.f32.partialorder %v2230_v7, 8.507059e+37  ;;  %v2755_v61 = vld [vmem:[%s3869_s17] ss:$0 sm:$0xff] }
 0x5d3   :  { %v2220_v58 = vmul.f32 %v2219_v27, %v3729_v14  ;;  %v2234_v24 = vsel %vm2231_vm8, %v2233_v5, %v2229_v15  ;;  %2800 = vrcp.f32 %v2204_v59  ;;  %v2245_v48 = vand.u32 2147483647, %v2204_v59 }
 0x5d4   :  { %v2235_v16 = vmul.f32 %v2234_v24, %v3731_v45  ;;  %2802 = vrcp.f32 %v2205_v0  ;;  %v2247_v60 = vand.u32 2147483648, %v2204_v59  ;;  %v2262_v38 = vand.u32 2147483648, %v2205_v0 }
 0x5d5   :  { %v2275_v23 = vsel %vm114_vm0, %v2220_v58, 0  ;;  %v2260_v22 = vand.u32 2147483647, %v2205_v0  ;;  %vm2241_vm11 = vweird.f32 %v2204_v59  ;;  %vm2256_vm13 = vweird.f32 %v2205_v0 }
 0x5d6   :  { %v3786_v47 = vand.u32 4294901760, %v2275_v23  ;;  %v2278_v57 = vsel %vm114_vm0, %v2235_v16, 0  ;;  %v2248_v55 = vor.u32 1.1754944e-38, %v2247_v60  ;;  %vm2246_vm14 = vcmp.eq.f32.partialorder %v2245_v48, 8.507059e+37 }
 0x5d7   :  { %v3789_v62 = vand.u32 4294901760, %v2278_v57  ;;  %v2263_v33 = vor.u32 1.1754944e-38, %v2262_v38  ;;  %vm2261_vm3 = vcmp.eq.f32.partialorder %v2260_v22, 8.507059e+37 }
 0x5d8   :  { %v2307_v29 = vsub.f32 %v2275_v23, %v3786_v47  ;;  %2376 = vmatmul.f32.vlgmr.msrb.gmra.mxu1 %v3786_v47 }
 0x5d9   :  { %v2801_v2 = vpop.eup %2800  ;;  %v2315_v54 = vsub.f32 %v2278_v57, %v3789_v62 }
 0x5da   :  { %v2803_v53 = vpop.eup %2802  ;;  %2418 = vmatmul.f32.vlgmr.msrb.gmra.mxu2 %v2307_v29  ;;  %v2308_v14 = vand.u32 4294901760, %v2307_v29  ;;  %v2237_v45 = vmul.f32 %v2801_v2, %v2204_v59  ;;  %vm2242_vm9 = vweird.f32 %v2801_v2 }
 0x5db   :  { %v2252_v9 = vmul.f32 %v2803_v53, %v2205_v0  ;;  %v2316_v40 = vand.u32 4294901760, %v2315_v54  ;;  %vm2257_vm10 = vweird.f32 %v2803_v53  ;;  %vm2243_vm12 = vmor %vm2241_vm11, %vm2242_vm9 }
 0x5dc   :  { %2460 = vmatmul.f32.vlgmr.msrb.gmra.mxu3 %v2308_v14  ;;  %v2309_v39 = vsub.f32 %v2307_v29, %v2308_v14  ;;  %v2238_v30 = vsub.f32 1.0, %v2237_v45  ;;  %vm2258_vm15 = vmor %vm2256_vm13, %vm2257_vm10 }
 0x5dd   :  { %v2253_v52 = vsub.f32 1.0, %v2252_v9  ;;  %v2317_v28 = vsub.f32 %v2315_v54, %v2316_v40 }
 0x5de   :  { %v2310_v13 = vand.u32 4294901760, %v2309_v39  ;;  %v2239_v35 = vmul.f32 %v2801_v2, %v2238_v30 }
 0x5df   :  { %v2254_v36 = vmul.f32 %v2803_v53, %v2253_v52  ;;  %v2318_v6 = vand.u32 4294901760, %v2317_v28 }
 0x5e0   :  { %2311 = vmatmul.f32.vlgmr.msrb.gmra.mxu0 %v2310_v13  ;;  %2380 = vmatmul.f32.gmra.mxu1 %v3789_v62  ;;  %v2240_v19 = vadd.f32 %v2801_v2, %v2239_v35 }
 0x5e1   :  { %v2255_v43 = vadd.f32 %v2803_v53, %v2254_v36 }
 0x5e2   :  { %2423 = vmatmul.f32.gmra.mxu2 %v2315_v54  ;;  %v2244_v42 = vsel %vm2243_vm12, %v2801_v2, %v2240_v19 }
 0x5e3   :  { %v2249_v51 = vsel %vm2246_vm14, %v2248_v55, %v2244_v42  ;;  %v2259_v50 = vsel %vm2258_vm15, %v2803_v53, %v2255_v43 }
 0x5e4   :  { %2466 = vmatmul.f32.gmra.mxu3 %v2316_v40  ;;  %v2250_v56 = vmul.f32 %v2249_v51, %v2194_v49  ;;  %v2264_v4 = vsel %vm2261_vm3, %v2263_v33, %v2259_v50 }
 0x5e5   :  { %v2265_v31 = vmul.f32 %v2264_v4, %v2195_v8 }
 0x5e6   :  { %v2281_v7 = vsel %vm114_vm0, %v2250_v56, 0 }
 0x5e7   :  { %v2322_v25 = vand.u32 4294901760, %v2281_v7  ;;  %v2284_v12 = vsel %vm114_vm0, %v2265_v31, 0 }
 0x5e8   :  { %2319 = vmatmul.f32.gmra.mxu0 %v2318_v6  ;;  %v2330_v10 = vand.u32 4294901760, %v2284_v12 }
 0x5e9   :  { %2384 = vmatmul.f32.gmra.mxu1 %v2322_v25  ;;  %v2323_v11 = vsub.f32 %v2281_v7, %v2322_v25 }
 0x5ea   :  { %v2331_v18 = vsub.f32 %v2284_v12, %v2330_v10 }
 0x5eb   :  { %2428 = vmatmul.f32.gmra.mxu2 %v2323_v11  ;;  %v2324_v3 = vand.u32 4294901760, %v2323_v11 }
 0x5ec   :  { %v2332_v32 = vand.u32 4294901760, %v2331_v18 }
 0x5ed   :  { %2472 = vmatmul.f32.gmra.mxu3 %v2324_v3  ;;  %v2325_v37 = vsub.f32 %v2323_v11, %v2324_v3 }
 0x5ee   :  { %v2333_v21 = vsub.f32 %v2331_v18, %v2332_v32 }
 0x5ef   :  { %v2326_v41 = vand.u32 4294901760, %v2325_v37 }
 0x5f0   :  { %v2334_v34 = vand.u32 4294901760, %v2333_v21 }
 0x5f1   :  { %2327 = vmatmul.f32.gmra.mxu0 %v2326_v41  ;;  %2388 = vmatmul.f32.gmra.mxu1 %v2330_v10 }
 0x5f3   :  { %2433 = vmatmul.f32.gmra.mxu2 %v2331_v18 }
 0x5f5   :  { %2478 = vmatmul.f32.gmra.mxu3 %v2332_v32 }
 0x5f9   :  { %2335 = vmatmul.f32.gmra.mxu0 %v2334_v34  ;;  %2548 = vmatmul.f32.vlgmr.msra.gmra.mxu1 %v3786_v47 }
 0x601   :  { %2511 = vmatmul.f32.vlgmr.msra.gmra.mxu0 %v3786_v47  ;;  %2552 = vmatmul.f32.gmra.mxu1 %v3789_v62 }
 0x609   :  { %2515 = vmatmul.f32.gmra.mxu0 %v3789_v62  ;;  %2556 = vmatmul.f32.gmra.mxu1 %v2322_v25 }
 0x611   :  { %2519 = vmatmul.f32.gmra.mxu0 %v2322_v25  ;;  %2560 = vmatmul.f32.gmra.mxu1 %v2330_v10 }
 0x619   :  { %2523 = vmatmul.f32.gmra.mxu0 %v2330_v10 }
 0x655   :  { %v2377_v1 = vpop.f32.mrf.mxu1 }
 0x65d   :  { %v2312_v17 = vpop.f32.mrf.mxu0  ;;  %v2381_v63 = vpop.f32.mrf.mxu1 }
 0x65e   :  { %v2313_v26 = vadd.f32 %v2755_v61, %v2312_v17  ;;  %v2419_v5 = vpop.f32.mrf.mxu2 }
 0x65f   :  { %v2461_v0 = vpop.f32.mrf.mxu3 }
 0x660   :  { %v2378_v59 = vadd.f32 %v2377_v1, %v2313_v26 }
 0x662   :  { %v2420_v15 = vadd.f32 %v2419_v5, %v2378_v59 }
 0x664   :  { %v2462_v23 = vadd.f32 %v2461_v0, %v2420_v15 }
 0x665   :  { %v2320_v46 = vpop.f32.mrf.mxu0 }
 0x666   :  { %v2385_v20 = vpop.f32.mrf.mxu1  ;;  %v2321_v58 = vadd.f32 %v2755_v61, %v2320_v46  ;;  %v2424_v16 = vpop.f32.mrf.mxu2 }
 0x667   :  { %v2467_v29 = vpop.f32.mrf.mxu3 }
 0x668   :  { %v2382_v47 = vadd.f32 %v2381_v63, %v2321_v58 }
 0x66a   :  { %v2425_v2 = vadd.f32 %v2424_v16, %v2382_v47 }
 0x66c   :  { %v2468_v9 = vadd.f32 %v2467_v29, %v2425_v2 }
 0x66e   :  { %v2328_v49 = vpop.f32.mrf.mxu0  ;;  %v2389_v8 = vpop.f32.mrf.mxu1 }
 0x66f   :  { %v2329_v53 = vadd.f32 %v2755_v61, %v2328_v49  ;;  %v2429_v30 = vpop.f32.mrf.mxu2 }
 0x670   :  { %v2473_v40 = vpop.f32.mrf.mxu3 }
 0x671   :  { %v2386_v39 = vadd.f32 %v2385_v20, %v2329_v53 }
 0x673   :  { %v2430_v52 = vadd.f32 %v2429_v30, %v2386_v39 }
 0x675   :  { %v2474_v36 = vadd.f32 %v2473_v40, %v2430_v52 }
 0x676   :  { %v2336_v27 = vpop.f32.mrf.mxu0  ;;  %v2549_v24 = vpop.f32.mrf.mxu1 }
 0x677   :  { %v2337_v38 = vadd.f32 %v2755_v61, %v2336_v27  ;;  %v2434_v28 = vpop.f32.mrf.mxu2 }
 0x678   :  { %v2479_v50 = vpop.f32.mrf.mxu3 }
 0x679   :  { %v2390_v22 = vadd.f32 %v2389_v8, %v2337_v38 }
 0x67b   :  { %v2435_v42 = vadd.f32 %v2434_v28, %v2390_v22 }
 0x67d   :  { %v2480_v56 = vadd.f32 %v2479_v50, %v2435_v42 }
 0x67e   :  { %v2512_v57 = vpop.f32.mrf.mxu0  ;;  %v2553_v45 = vpop.f32.mrf.mxu1 }
 0x67f   :  { %v2513_v62 = vadd.f32 %v2512_v57, %v2462_v23 }
 0x681   :  { %v2550_v14 = vadd.f32 %v2549_v24, %v2513_v62 }
 0x683   :  { %v2566_v54 = vsel %vm114_vm0, %v2550_v14, 0.0 }
 0x684   :  { %2567 = vadd.xlane.f32.xlu0 %v2566_v54 }
 0x686   :  { %v2516_v48 = vpop.f32.mrf.mxu0  ;;  %v2557_v19 = vpop.f32.mrf.mxu1 }
 0x687   :  { %v2517_v60 = vadd.f32 %v2516_v48, %v2468_v9  ;;  %v3830_v9 = vld [vmem:[%s3870_s18] ss:$0 sm:$0xff]  ;;  %s2909_s18 = smov [#allocation7]  }
 0x688   :  { %v2757_v48 = vld [vmem:[%s3871_s19] ss:$0 sm:$0xff]  ;;  %s2696_s19 = sshll.u32 %s2909_s18, 4  ;;  %s2697_s19 = int_to_ptr.vmem [resolvable:$true] %s2696_s19 }
 0x689   :  { %v2554_v13 = vadd.f32 %v2553_v45, %v2517_v60 }
 0x68b   :  { %v2569_v35 = vsel %vm114_vm0, %v2554_v13, 0.0 }
 0x68c   :  { %2570 = vadd.xlane.f32.xlu2 %v2569_v35 }
 0x68e   :  { %v2520_v55 = vpop.f32.mrf.mxu0  ;;  %v2561_v6 = vpop.f32.mrf.mxu1 }
 0x68f   :  { %v2521_v43 = vadd.f32 %v2520_v55, %v2474_v36 }
 0x691   :  { %v2558_v33 = vadd.f32 %v2557_v19, %v2521_v43 }
 0x693   :  { %v2572_v51 = vsel %vm114_vm0, %v2558_v33, 0.0 }
 0x694   :  { %2573 = vadd.xlane.f32.xlu1 %v2572_v51 }
 0x696   :  { %v2524_v4 = vpop.f32.mrf.mxu0 }
 0x697   :  { %v2525_v31 = vadd.f32 %v2524_v4, %v2480_v56 }
 0x699   :  { %v2562_v7 = vadd.f32 %v2561_v6, %v2525_v31 }
 0x69b   :  { %v2575_v25 = vsel %vm114_vm0, %v2562_v7, 0.0 }
 0x69c   :  { %2576 = vadd.xlane.f32.xlu0 %v2575_v25 }
 0x6f7   :  { %v2568_v12 = vpop.xlane.xlu0 %2567 }
 0x6f8   :  { %v2578_v10 = vmul.f32 %v2568_v12, %v3270_v44 }
 0x6fa   :  { %v2582_v11 = vsub.f32 %v2550_v14, %v2578_v10 }
 0x6fc   :  { %v2586_v3 = vmul.f32 %v2582_v11, %v2582_v11 }
 0x6fe   :  { %v2590_v18 = vsel %vm114_vm0, %v2586_v3, 0.0 }
 0x6ff   :  { %v2571_v37 = vpop.xlane.xlu2 %2570  ;;  %2591 = vadd.xlane.f32.xlu2 %v2590_v18 }
 0x700   :  { %v2579_v41 = vmul.f32 %v2571_v37, %v3270_v44 }
 0x702   :  { %v2583_v32 = vsub.f32 %v2554_v13, %v2579_v41 }
 0x704   :  { %v2587_v21 = vmul.f32 %v2583_v32, %v2583_v32 }
 0x706   :  { %v2593_v34 = vsel %vm114_vm0, %v2587_v21, 0.0 }
 0x707   :  { %2594 = vadd.xlane.f32.xlu1 %v2593_v34  ;;  %v2574_v1 = vpop.xlane.xlu1 %2573 }
 0x708   :  { %v2580_v17 = vmul.f32 %v2574_v1, %v3270_v44 }
 0x70a   :  { %v3813_v63 = vsub.f32 %v2558_v33, %v2580_v17 }
 0x70c   :  { %v2588_v46 = vmul.f32 %v3813_v63, %v3813_v63 }
 0x70e   :  { %v2596_v20 = vsel %vm114_vm0, %v2588_v46, 0.0 }
 0x70f   :  { %v2577_v61 = vpop.xlane.xlu0 %2576  ;;  %2597 = vadd.xlane.f32.xlu0 %v2596_v20 }
 0x710   :  { %v2581_v49 = vmul.f32 %v2577_v61, %v3270_v44 }
 0x712   :  { %v3819_v8 = vsub.f32 %v2562_v7, %v2581_v49 }
 0x714   :  { %v2589_v26 = vmul.f32 %v3819_v8, %v3819_v8 }
 0x716   :  { %v2599_v5 = vsel %vm114_vm0, %v2589_v26, 0.0 }
 0x717   :  { %2600 = vadd.xlane.f32.xlu2 %v2599_v5 }
 0x772   :  { %v2592_v59 = vpop.xlane.xlu2 %2591 }
 0x773   :  { %v2602_v0 = vmul.f32 %v2592_v59, %v3270_v44 }
 0x775   :  { %v2606_v27 = vadd.f32 1e-05, %v2602_v0 }
 0x777   :  { %2804 = vrsqrt.f32 %v2606_v27  ;;  %vm2616_vm1 = vweird.f32 %v2606_v27 }
 0x77a   :  { %v2595_v15 = vpop.xlane.xlu1 %2594 }
 0x77b   :  { %v2603_v58 = vmul.f32 %v2595_v15, %v3270_v44 }
 0x77d   :  { %v2805_v24 = vpop.eup %2804  ;;  %v2607_v16 = vadd.f32 1e-05, %v2603_v58 }
 0x77e   :  { %v2611_v23 = vmul.f32 %v2805_v24, %v2606_v27  ;;  %vm2617_vm4 = vweird.f32 %v2805_v24 }
 0x77f   :  { %2806 = vrsqrt.f32 %v2607_v16  ;;  %vm2618_vm5 = vmor %vm2616_vm1, %vm2617_vm4  ;;  %vm2626_vm7 = vweird.f32 %v2607_v16 }
 0x780   :  { %v2612_v47 = vmul.f32 %v2805_v24, %v2611_v23 }
 0x782   :  { %v2613_v57 = vmul.f32 0.5, %v2612_v47  ;;  %v2598_v62 = vpop.xlane.xlu0 %2597 }
 0x783   :  { %v2604_v29 = vmul.f32 %v2598_v62, %v3270_v44 }
 0x784   :  { %v2614_v2 = vsub.f32 1.5, %v2613_v57 }
 0x785   :  { %v2807_v53 = vpop.eup %2806  ;;  %v2608_v14 = vadd.f32 1e-05, %v2604_v29 }
 0x786   :  { %v2615_v54 = vmul.f32 %v2805_v24, %v2614_v2  ;;  %v2621_v45 = vmul.f32 %v2807_v53, %v2607_v16  ;;  %vm2627_vm6 = vweird.f32 %v2807_v53 }
 0x787   :  { %2808 = vrsqrt.f32 %v2608_v14  ;;  %vm2628_vm2 = vmor %vm2626_vm7, %vm2627_vm6  ;;  %vm2636_vm9 = vweird.f32 %v2608_v14 }
 0x788   :  { %v2619_v39 = vsel %vm2618_vm5, %v2805_v24, %v2615_v54  ;;  %v2622_v30 = vmul.f32 %v2807_v53, %v2621_v45 }
 0x789   :  { %v2650_v60 = vmul.f32 %v2619_v39, %v2582_v11 }
 0x78a   :  { %v2623_v52 = vmul.f32 0.5, %v2622_v30  ;;  %v2601_v38 = vpop.xlane.xlu2 %2600 }
 0x78b   :  { %v2657_v13 = vmul.f32 %v3830_v9, %v2650_v60  ;;  %v2605_v40 = vmul.f32 %v2601_v38, %v3270_v44 }
 0x78c   :  { %v2624_v35 = vsub.f32 1.5, %v2623_v52 }
 0x78d   :  { %v2809_v36 = vpop.eup %2808  ;;  %v2664_v22 = vadd.f32 %v2757_v48, %v2657_v13  ;;  %v2609_v19 = vadd.f32 1e-05, %v2605_v40 }
 0x78e   :  { %v2625_v55 = vmul.f32 %v2807_v53, %v2624_v35  ;;  %v2631_v43 = vmul.f32 %v2809_v36, %v2608_v14  ;;  %vm2637_vm8 = vweird.f32 %v2809_v36 }
 0x78f   :  { %v2672_v28 = vmul.f32 1.442695, %v2664_v22  ;;  %2810 = vrsqrt.f32 %v2609_v19  ;;  %vm2638_vm10 = vmor %vm2636_vm9, %vm2637_vm8  ;;  %vm2668_vm11 = vcmp.gt.f32.partialorder %v2664_v22, 0.0  ;;  %vm2646_vm13 = vweird.f32 %v2609_v19 }
 0x790   :  { %v2629_v42 = vsel %vm2628_vm2, %v2807_v53, %v2625_v55  ;;  %v2632_v33 = vmul.f32 %v2809_v36, %v2631_v43 }
 0x791   :  { %2812 = vpow2.f32 %v2672_v28  ;;  %v2651_v51 = vmul.f32 %v2629_v42, %v2583_v32 }
 0x792   :  { %v2633_v50 = vmul.f32 0.5, %v2632_v33 }
 0x793   :  { %v2658_v56 = vmul.f32 %v3830_v9, %v2651_v51 }
 0x794   :  { %v2634_v4 = vsub.f32 1.5, %v2633_v50 }
 0x795   :  { %v2811_v44 = vpop.eup %2810  ;;  %v2665_v31 = vadd.f32 %v2757_v48, %v2658_v56 }
 0x796   :  { %v2635_v6 = vmul.f32 %v2809_v36, %v2634_v4  ;;  %v2641_v7 = vmul.f32 %v2811_v44, %v2609_v19  ;;  %vm2647_vm12 = vweird.f32 %v2811_v44 }
 0x797   :  { %v2813_v25 = vpop.eup %2812  ;;  %v2674_v12 = vmul.f32 1.442695, %v2665_v31  ;;  %vm2648_vm14 = vmor %vm2646_vm13, %vm2647_vm12  ;;  %vm2669_vm15 = vcmp.gt.f32.partialorder %v2665_v31, 0.0 }
 0x798   :  { %v2639_v10 = vsel %vm2638_vm10, %v2809_v36, %v2635_v6  ;;  %v2642_v11 = vmul.f32 %v2811_v44, %v2641_v7  ;;  %v2721_v3 = vadd.f32 -1.0, %v2813_v25 }
 0x799   :  { %2814 = vpow2.f32 %v2674_v12  ;;  %v2652_v18 = vmul.f32 %v2639_v10, %v3813_v63 }
 0x79a   :  { %v2643_v37 = vmul.f32 0.5, %v2642_v11  ;;  %v2684_v41 = vsel %vm2668_vm11, %v2664_v22, %v2721_v3 }
 0x79b   :  { %v2659_v32 = vmul.f32 %v3830_v9, %v2652_v18  ;;  %2688 = vst.msk [vmem:[#allocation7] sm:$0xff] %vm114_vm0, %v2684_v41 }
 0x79c   :  { %v2644_v21 = vsub.f32 1.5, %v2643_v37 }
 0x79d   :  { %v2666_v34 = vadd.f32 %v2757_v48, %v2659_v32 }
 0x79e   :  { %v2645_v1 = vmul.f32 %v2811_v44, %v2644_v21 }
 0x79f   :  { %v2815_v17 = vpop.eup %2814  ;;  %v2676_v46 = vmul.f32 1.442695, %v2666_v34  ;;  %vm2670_vm3 = vcmp.gt.f32.partialorder %v2666_v34, 0.0 }
 0x7a0   :  { %v2649_v20 = vsel %vm2648_vm14, %v2811_v44, %v2645_v1  ;;  %v2722_v61 = vadd.f32 -1.0, %v2815_v17 }
 0x7a1   :  { %2816 = vpow2.f32 %v2676_v46  ;;  %v2653_v63 = vmul.f32 %v2649_v20, %v3819_v8 }
 0x7a2   :  { %v2685_v49 = vsel %vm2669_vm15, %v2665_v31, %v2722_v61 }
 0x7a3   :  { %v2660_v26 = vmul.f32 %v3830_v9, %v2653_v63  ;;  %2689 = vst.msk [vmem:[#allocation7 + $0x8] sm:$0xff] %vm114_vm0, %v2685_v49 }
 0x7a5   :  { %v2667_v5 = vadd.f32 %v2757_v48, %v2660_v26 }
 0x7a7   :  { %v2817_v59 = vpop.eup %2816  ;;  %v2678_v0 = vmul.f32 1.442695, %v2667_v5  ;;  %vm2671_vm4 = vcmp.gt.f32.partialorder %v2667_v5, 0.0 }
 0x7a8   :  { %v2723_v27 = vadd.f32 -1.0, %v2817_v59 }
 0x7a9   :  { %2818 = vpow2.f32 %v2678_v0 }
 0x7aa   :  { %v2686_v15 = vsel %vm2670_vm3, %v2666_v34, %v2723_v27 }
 0x7ab   :  { %2690 = vst.msk [vmem:[#allocation7 + $0x10] sm:$0xff] %vm114_vm0, %v2686_v15 }
 0x7af   :  { %v2819_v8 = vpop.eup %2818 }
 0x7b0   :  { %v2724_v58 = vadd.f32 -1.0, %v2819_v8 }
 0x7b2   :  { %v2687_v24 = vsel %vm2671_vm4, %v2667_v5, %v2724_v58 }
 0x7b3   :  { %2691 = vst.msk [vmem:[#allocation7 + $0x18] sm:$0xff] %vm114_vm0, %v2687_v24 }
 0x7b4   :  { %2704 = dma.vmem_to_hbm [thread:$0]  %s2697_s19, 512, %s2699_s12, [#allocation4], %s2899_s27, %s2899_s27, %s2900_s28  }
 0x7b5   :  { %2896 = dma.done.wait [#allocation4], 512  }
 0x7b6   :  { %2897 = vsyncadd [#allocation4], 4294966784 }
 0x7b7   :  { %2709 = vsyncpa [#allocation3], 1 }
 0x7b8   :  { %2710 = vsyncpa [#allocation6], 1 }
 0x7b9   :  { %2711 = vsyncpa [#allocation4], 1 }

</bundles_post_ra>
